<compile_context>
chip_gen: v5e
topology: v5e:2x2
jax: 0.10.0
libtpu: 0.0.40
codegen_flags: <defaults>
</compile_context>

<pallas_src>
import jax
import jax.numpy as jnp
from jax.experimental import pallas as pl
from jax.experimental.pallas import tpu as pltpu

# ----------------------------- model sizes (small demo analogs) --------------
B = 16              # batch (rows after .view(-1, shape1))
C, H, W = 4, 8, 8
SHAPE1 = C * H * W  # 256   (analog of 24000)
SHAPE = 384         # analog of 23436
HIDDEN = 1024       # fc1 hidden size (same as the module)

NEG_SLOPE = 0.01    # F.leaky_relu default


# ----------------------------- fused Pallas kernel ---------------------------
def _outblock_kernel(x_ref, w1_ref, b1_ref, w2_ref, b2_ref,
                     wfc_ref, bfc_ref, wfci_ref, bfci_ref,
                     p_ref, v_ref):
    """Fused OutBlock forward for one row block (here the whole batch).

    value head : v = tanh(fc2(leaky_relu(fc1(x))))        -> (tm, 1)
    policy head: p = softmax(fcinter(leaky_relu(fc(x))))  -> (tm, SHAPE)
    Dropout is an inference-mode identity.
    """
    # x is loaded once and cast to bf16 so both GEMM paths hit the bf16 MXU.
    xb = x_ref[...].astype(jnp.bfloat16)

    # ---- value head first (store v before the policy vregs go live) ---------
    h = jnp.dot(xb, w1_ref[...], preferred_element_type=jnp.float32)
    h = h + b1_ref[...]
    h = jnp.where(h >= 0, h, NEG_SLOPE * h)                    # leaky_relu
    # fc2: lane-major (1, HIDDEN) f32 row, VPU multiply + lane reduction.
    acc = jnp.sum(h * w2_ref[...], axis=-1, keepdims=True) + b2_ref[0]
    v_ref[...] = jnp.tanh(acc).astype(v_ref.dtype)

    # ---- policy head ---------------------------------------------------------
    g = jnp.dot(xb, wfc_ref[...], preferred_element_type=jnp.float32)
    g = g + bfc_ref[...]
    g = jnp.where(g >= 0, g, NEG_SLOPE * g)                    # leaky_relu
    logits = jnp.dot(g.astype(jnp.bfloat16), wfci_ref[...],
                     preferred_element_type=jnp.float32)
    logits = logits + bfci_ref[...]
    # numerically-stable softmax (== logsoftmax.exp()) over the full row
    m = jnp.max(logits, axis=-1, keepdims=True)
    e = jnp.exp(logits - m)
    denom = jnp.sum(e, axis=-1, keepdims=True)
    p_ref[...] = (e * pl.reciprocal(denom, approx=False)).astype(p_ref.dtype)


# ----------------------------- wrapper ----------------------------------------
def outblock_fused(x, w1t, b1, w2_row, b2, wfct, bfc, wfcit, bfci, *, tm=16):
    """x:(M,SHAPE1) f32; w1t:(SHAPE1,HIDDEN) bf16; wfct:(SHAPE1,SHAPE1) bf16;
    wfcit:(SHAPE1,SHAPE) bf16; w2_row:(HIDDEN,) f32; biases f32.
    Returns (p:(M,SHAPE), v:(M,1))."""
    M, K = x.shape
    Kw1, N1 = w1t.shape
    Kfc, Nfc = wfct.shape
    Kfi, N2 = wfcit.shape
    assert K == Kw1 == Kfc and Nfc == Kfi and M % tm == 0

    # Advisory cost hint for the XLA scheduler around the custom call.
    flops = 2 * M * (K * N1 + N1 + K * Nfc + Nfc * N2)
    transcendentals = M * (1 + N2)                 # tanh + exp per policy entry
    bytes_accessed = (x.size * 4
                      + (w1t.size + wfct.size + wfcit.size) * 2   # bf16 weights
                      + (b1.size + w2_row.size + b2.size + bfc.size + bfci.size) * 4
                      + M * N2 * 4 + M * 4)

    return pl.pallas_call(
        _outblock_kernel,
        out_shape=(jax.ShapeDtypeStruct((M, N2), x.dtype),   # p
                   jax.ShapeDtypeStruct((M, 1), x.dtype)),   # v
        grid_spec=pltpu.PrefetchScalarGridSpec(
            num_scalar_prefetch=0,
            grid=(M // tm,),                                  # = (1,) here
            in_specs=[
                pl.BlockSpec((tm, K), lambda i: (i, 0)),      # x row block
                pl.BlockSpec((K, N1), lambda i: (0, 0)),      # fc1^T (bf16, resident)
                pl.BlockSpec((1, N1), lambda i: (0, 0)),      # fc1 bias
                pl.BlockSpec((1, N1), lambda i: (0, 0)),      # fc2 lane-major row (f32)
                pl.BlockSpec(memory_space=pltpu.MemorySpace.SMEM),  # fc2 scalar bias
                pl.BlockSpec((Kfc, Nfc), lambda i: (0, 0)),   # fc^T (bf16, resident)
                pl.BlockSpec((1, Nfc), lambda i: (0, 0)),     # fc bias
                pl.BlockSpec((Kfi, N2), lambda i: (0, 0)),    # fcinter^T (bf16, resident)
                pl.BlockSpec((1, N2), lambda i: (0, 0)),      # fcinter bias
            ],
            out_specs=(
                pl.BlockSpec((tm, N2), lambda i: (i, 0)),     # p (lane-dense)
                pl.BlockSpec((tm, 1), lambda i: (i, 0)),      # v
            ),
        ),
        compiler_params=pltpu.CompilerParams(
            # Weight-DMA-bound: do not megacore-shard the row axis.
            dimension_semantics=("arbitrary",),
            vmem_limit_bytes=32 * 1024 * 1024,
        ),
        cost_estimate=pl.CostEstimate(
            flops=flops,
            transcendentals=transcendentals,
            bytes_accessed=bytes_accessed),
    )(x, w1t, b1.reshape(1, N1), w2_row.reshape(1, N1), b2,
      wfct, bfc.reshape(1, Nfc), wfcit, bfci.reshape(1, N2))


# ----------------------------- params (pre-transposed, bf16 big weights) ------
def init_params(key):
    ks = jax.random.split(key, 8)

    def lin(kw, kb, out_f, in_f):
        bound = 1.0 / float(in_f) ** 0.5
        w = jax.random.uniform(kw, (out_f, in_f), jnp.float32, -bound, bound)
        b = jax.random.uniform(kb, (out_f,), jnp.float32, -bound, bound)
        return w, b

    fc1_w, fc1_b = lin(ks[0], ks[1], HIDDEN, SHAPE1)
    fc2_w, fc2_b = lin(ks[2], ks[3], 1, HIDDEN)
    fc_w, fc_b = lin(ks[4], ks[5], SHAPE1, SHAPE1)
    fci_w, fci_b = lin(ks[6], ks[7], SHAPE, SHAPE1)

    # Transpose + cast ONCE at init (outside jit) -> no per-forward HBM transposes.
    return {
        "fc1_wT": fc1_w.T.astype(jnp.bfloat16),   # (SHAPE1, HIDDEN)
        "fc1_b": fc1_b,                           # (HIDDEN,)  f32
        "fc2_w_row": fc2_w.reshape(-1),           # (HIDDEN,)  f32 lane-major row
        "fc2_b": fc2_b,                           # (1,)       f32 -> SMEM
        "fc_wT": fc_w.T.astype(jnp.bfloat16),     # (SHAPE1, SHAPE1)
        "fc_b": fc_b,                             # (SHAPE1,)  f32
        "fci_wT": fci_w.T.astype(jnp.bfloat16),   # (SHAPE1, SHAPE)
        "fci_b": fci_b,                           # (SHAPE,)   f32
    }


# ----------------------------- OutBlock forward -------------------------------
@jax.jit
def outblock_forward(params, s):
    x = s.reshape(-1, SHAPE1)                     # s.view(-1, shape1)
    p, v = outblock_fused(
        x,
        params["fc1_wT"], params["fc1_b"],
        params["fc2_w_row"], params["fc2_b"],
        params["fc_wT"], params["fc_b"],
        params["fci_wT"], params["fci_b"],
    )
    return p, v


# ----------------------------- reference (pure JAX, same precision) -----------
def outblock_reference(params, s):
    x = s.reshape(-1, SHAPE1)
    xb = x.astype(jnp.bfloat16)
    leaky = lambda z: jnp.where(z >= 0, z, NEG_SLOPE * z)
    h = leaky(jnp.dot(xb, params["fc1_wT"], preferred_element_type=jnp.float32)
              + params["fc1_b"])
    v = jnp.tanh(h @ params["fc2_w_row"][:, None] + params["fc2_b"])
    g = leaky(jnp.dot(xb, params["fc_wT"], preferred_element_type=jnp.float32)
              + params["fc_b"])
    logits = jnp.dot(g.astype(jnp.bfloat16), params["fci_wT"],
                     preferred_element_type=jnp.float32) + params["fci_b"]
    p = jnp.exp(jax.nn.log_softmax(logits, axis=1))
    return p, v


# ----------------------------- main --------------------------------------------
if __name__ == "__main__":
    key = jax.random.PRNGKey(0)
    k_param, k_x = jax.random.split(key)
    params = init_params(k_param)
    s = jax.random.normal(k_x, (B, C, H, W), jnp.float32)  # NCHW

    p, v = outblock_forward(params, s)
    jax.block_until_ready((p, v))

    p_ref, v_ref = jax.jit(outblock_reference)(params, s)
    jax.block_until_ready((p_ref, v_ref))

    assert p.shape == (B, SHAPE) and v.shape == (B, 1)
    # bf16 weights / activations are mirrored in the reference, so only
    # accumulation-order noise remains -> 1e-3 is comfortably safe.
    assert jnp.allclose(p, p_ref, atol=1e-3, rtol=1e-3)
    assert jnp.allclose(v, v_ref, atol=1e-3, rtol=1e-3)
    # rows of p sum to 1 (exact reciprocal in the kernel)
    assert jnp.allclose(jnp.sum(p, axis=1), jnp.ones((B,)), atol=1e-4)

    print("KERNEL_OK")
</pallas_src>

<mosaic_0001>
module attributes {stable_mosaic.version = 11 : i64} {
  func.func @_outblock_kernel(%arg0: i32, %arg1: memref<16x256xf32, #tpu.memory_space<vmem>>, %arg2: memref<256x1024xbf16, #tpu.memory_space<vmem>>, %arg3: memref<1x1024xf32, #tpu.memory_space<vmem>>, %arg4: memref<1x1024xf32, #tpu.memory_space<vmem>>, %arg5: memref<1xf32, #tpu.memory_space<smem>>, %arg6: memref<256x256xbf16, #tpu.memory_space<vmem>>, %arg7: memref<1x256xf32, #tpu.memory_space<vmem>>, %arg8: memref<256x384xbf16, #tpu.memory_space<vmem>>, %arg9: memref<1x384xf32, #tpu.memory_space<vmem>>, %arg10: memref<16x384xf32, #tpu.memory_space<vmem>>, %arg11: memref<16x1xf32, #tpu.memory_space<vmem>>) attributes {dimension_semantics = [#tpu.dimension_semantics<arbitrary>], iteration_bounds = array<i64: 1>, scalar_prefetch = 0 : i64, scratch_operands = 0 : i64, tpu.core_type = #tpu.core_type<tc>, window_params = [{transform_indices = @transform_0, window_bounds = array<i64: 16, 256>}, {pipeline_mode = #tpu.pipeline_mode<synchronous>, transform_indices = @transform_1, window_bounds = array<i64: 256, 1024>}, {pipeline_mode = #tpu.pipeline_mode<synchronous>, transform_indices = @transform_2, window_bounds = array<i64: 1, 1024>}, {pipeline_mode = #tpu.pipeline_mode<synchronous>, transform_indices = @transform_3, window_bounds = array<i64: 1, 1024>}, {transform_indices = @transform_4, window_bounds = array<i64: 1>}, {pipeline_mode = #tpu.pipeline_mode<synchronous>, transform_indices = @transform_5, window_bounds = array<i64: 256, 256>}, {pipeline_mode = #tpu.pipeline_mode<synchronous>, transform_indices = @transform_6, window_bounds = array<i64: 1, 256>}, {pipeline_mode = #tpu.pipeline_mode<synchronous>, transform_indices = @transform_7, window_bounds = array<i64: 256, 384>}, {pipeline_mode = #tpu.pipeline_mode<synchronous>, transform_indices = @transform_8, window_bounds = array<i64: 1, 384>}, {transform_indices = @transform_9, window_bounds = array<i64: 16, 384>}, {transform_indices = @transform_10, window_bounds = array<i64: 16, 1>}]} {
    %c0 = arith.constant 0 : index
    %c0_0 = arith.constant 0 : index
    %0 = vector.load %arg1[%c0, %c0_0] : memref<16x256xf32, #tpu.memory_space<vmem>>, vector<16x256xf32>
    %1 = arith.truncf %0 : vector<16x256xf32> to vector<16x256xbf16>
    %c0_1 = arith.constant 0 : index
    %c0_2 = arith.constant 0 : index
    %2 = vector.load %arg2[%c0_1, %c0_2] : memref<256x1024xbf16, #tpu.memory_space<vmem>>, vector<256x1024xbf16>
    %cst = arith.constant dense<0.000000e+00> : vector<16x1024xf32>
    %3 = tpu.matmul %1, %2, %cst {dimension_numbers = #tpu.dot_dimension_numbers<[1], [0], [0], [1], [0, 0, 1, 1], [], []>} : vector<16x256xbf16>, vector<256x1024xbf16>, vector<16x1024xf32> -> vector<16x1024xf32>
    %c0_3 = arith.constant 0 : index
    %c0_4 = arith.constant 0 : index
    %4 = vector.load %arg3[%c0_3, %c0_4] : memref<1x1024xf32, #tpu.memory_space<vmem>>, vector<1x1024xf32>
    %5 = vector.broadcast %4 : vector<1x1024xf32> to vector<16x1024xf32>
    %6 = arith.addf %3, %5 : vector<16x1024xf32>
    %cst_5 = arith.constant 0.000000e+00 : f32
    %7 = vector.broadcast %cst_5 : f32 to vector<16x1024xf32>
    %8 = arith.cmpf oge, %6, %7 : vector<16x1024xf32>
    %cst_6 = arith.constant 0.00999999977 : f32
    %9 = vector.broadcast %cst_6 : f32 to vector<16x1024xf32>
    %10 = arith.mulf %9, %6 : vector<16x1024xf32>
    %11 = arith.select %8, %6, %10 : vector<16x1024xi1>, vector<16x1024xf32>
    %c0_7 = arith.constant 0 : index
    %c0_8 = arith.constant 0 : index
    %12 = vector.load %arg4[%c0_7, %c0_8] : memref<1x1024xf32, #tpu.memory_space<vmem>>, vector<1x1024xf32>
    %13 = vector.broadcast %12 : vector<1x1024xf32> to vector<16x1024xf32>
    %14 = arith.mulf %11, %13 : vector<16x1024xf32>
    %cst_9 = arith.constant dense<0.000000e+00> : vector<16xf32>
    %15 = vector.multi_reduction <add>, %14, %cst_9 [1] : vector<16x1024xf32> to vector<16xf32>
    %16 = vector.shape_cast %15 : vector<16xf32> to vector<16x1xf32>
    %c0_10 = arith.constant 0 : index
    %17 = memref.load %arg5[%c0_10] : memref<1xf32, #tpu.memory_space<smem>>
    %18 = vector.broadcast %17 : f32 to vector<16x1xf32>
    %19 = arith.addf %16, %18 : vector<16x1xf32>
    %20 = math.tanh %19 : vector<16x1xf32>
    %c0_11 = arith.constant 0 : index
    %c0_12 = arith.constant 0 : index
    %21 = vector.load %arg11[%c0_11, %c0_12] : memref<16x1xf32, #tpu.memory_space<vmem>>, vector<16x1xf32>
    tpu.vector_store %arg11[%c0_11, %c0_12], %20 {strides = array<i32>} : memref<16x1xf32, #tpu.memory_space<vmem>>, vector<16x1xf32>,
    %c0_13 = arith.constant 0 : index
    %c0_14 = arith.constant 0 : index
    %22 = vector.load %arg6[%c0_13, %c0_14] : memref<256x256xbf16, #tpu.memory_space<vmem>>, vector<256x256xbf16>
    %cst_15 = arith.constant dense<0.000000e+00> : vector<16x256xf32>
    %23 = tpu.matmul %1, %22, %cst_15 {dimension_numbers = #tpu.dot_dimension_numbers<[1], [0], [0], [1], [0, 0, 1, 1], [], []>} : vector<16x256xbf16>, vector<256x256xbf16>, vector<16x256xf32> -> vector<16x256xf32>
    %c0_16 = arith.constant 0 : index
    %c0_17 = arith.constant 0 : index
    %24 = vector.load %arg7[%c0_16, %c0_17] : memref<1x256xf32, #tpu.memory_space<vmem>>, vector<1x256xf32>
    %25 = vector.broadcast %24 : vector<1x256xf32> to vector<16x256xf32>
    %26 = arith.addf %23, %25 : vector<16x256xf32>
    %cst_18 = arith.constant 0.000000e+00 : f32
    %27 = vector.broadcast %cst_18 : f32 to vector<16x256xf32>
    %28 = arith.cmpf oge, %26, %27 : vector<16x256xf32>
    %cst_19 = arith.constant 0.00999999977 : f32
    %29 = vector.broadcast %cst_19 : f32 to vector<16x256xf32>
    %30 = arith.mulf %29, %26 : vector<16x256xf32>
    %31 = arith.select %28, %26, %30 : vector<16x256xi1>, vector<16x256xf32>
    %32 = arith.truncf %31 : vector<16x256xf32> to vector<16x256xbf16>
    %c0_20 = arith.constant 0 : index
    %c0_21 = arith.constant 0 : index
    %33 = vector.load %arg8[%c0_20, %c0_21] : memref<256x384xbf16, #tpu.memory_space<vmem>>, vector<256x384xbf16>
    %cst_22 = arith.constant dense<0.000000e+00> : vector<16x384xf32>
    %34 = tpu.matmul %32, %33, %cst_22 {dimension_numbers = #tpu.dot_dimension_numbers<[1], [0], [0], [1], [0, 0, 1, 1], [], []>} : vector<16x256xbf16>, vector<256x384xbf16>, vector<16x384xf32> -> vector<16x384xf32>
    %c0_23 = arith.constant 0 : index
    %c0_24 = arith.constant 0 : index
    %35 = vector.load %arg9[%c0_23, %c0_24] : memref<1x384xf32, #tpu.memory_space<vmem>>, vector<1x384xf32>
    %36 = vector.broadcast %35 : vector<1x384xf32> to vector<16x384xf32>
    %37 = arith.addf %34, %36 : vector<16x384xf32>
    %cst_25 = arith.constant dense<0xFF800000> : vector<16xf32>
    %38 = vector.multi_reduction <maximumf>, %37, %cst_25 [1] : vector<16x384xf32> to vector<16xf32>
    %39 = vector.shape_cast %38 : vector<16xf32> to vector<16x1xf32>
    %40 = vector.broadcast %39 : vector<16x1xf32> to vector<16x384xf32>
    %41 = arith.subf %37, %40 : vector<16x384xf32>
    %42 = math.exp %41 : vector<16x384xf32>
    %cst_26 = arith.constant dense<0.000000e+00> : vector<16xf32>
    %43 = vector.multi_reduction <add>, %42, %cst_26 [1] : vector<16x384xf32> to vector<16xf32>
    %44 = vector.shape_cast %43 : vector<16xf32> to vector<16x1xf32>
    %45 = tpu.reciprocal %44 : vector<16x1xf32> -> vector<16x1xf32>
    %46 = vector.broadcast %45 : vector<16x1xf32> to vector<16x384xf32>
    %47 = arith.mulf %42, %46 : vector<16x384xf32>
    %c0_27 = arith.constant 0 : index
    %c0_28 = arith.constant 0 : index
    %48 = vector.load %arg10[%c0_27, %c0_28] : memref<16x384xf32, #tpu.memory_space<vmem>>, vector<16x384xf32>
    tpu.vector_store %arg10[%c0_27, %c0_28], %47 {strides = array<i32>} : memref<16x384xf32, #tpu.memory_space<vmem>>, vector<16x384xf32>,
    return
  }
  func.func @transform_0(%arg0: i32) -> (i32, i32) {
    %c0_i32 = arith.constant 0 : i32
    %c0_i32_0 = arith.constant 0 : i32
    return %arg0, %c0_i32 : i32, i32
  }
  func.func @transform_1(%arg0: i32) -> (i32, i32) {
    %c0_i32 = arith.constant 0 : i32
    %c0_i32_0 = arith.constant 0 : i32
    %c0_i32_1 = arith.constant 0 : i32
    return %c0_i32, %c0_i32_0 : i32, i32
  }
  func.func @transform_2(%arg0: i32) -> (i32, i32) {
    %c0_i32 = arith.constant 0 : i32
    %c0_i32_0 = arith.constant 0 : i32
    %c0_i32_1 = arith.constant 0 : i32
    return %c0_i32, %c0_i32_0 : i32, i32
  }
  func.func @transform_3(%arg0: i32) -> (i32, i32) {
    %c0_i32 = arith.constant 0 : i32
    %c0_i32_0 = arith.constant 0 : i32
    %c0_i32_1 = arith.constant 0 : i32
    return %c0_i32, %c0_i32_0 : i32, i32
  }
  func.func @transform_4(%arg0: i32) -> i32 {
    %c0_i32 = arith.constant 0 : i32
    %c0_i32_0 = arith.constant 0 : i32
    return %c0_i32 : i32
  }
  func.func @transform_5(%arg0: i32) -> (i32, i32) {
    %c0_i32 = arith.constant 0 : i32
    %c0_i32_0 = arith.constant 0 : i32
    %c0_i32_1 = arith.constant 0 : i32
    return %c0_i32, %c0_i32_0 : i32, i32
  }
  func.func @transform_6(%arg0: i32) -> (i32, i32) {
    %c0_i32 = arith.constant 0 : i32
    %c0_i32_0 = arith.constant 0 : i32
    %c0_i32_1 = arith.constant 0 : i32
    return %c0_i32, %c0_i32_0 : i32, i32
  }
  func.func @transform_7(%arg0: i32) -> (i32, i32) {
    %c0_i32 = arith.constant 0 : i32
    %c0_i32_0 = arith.constant 0 : i32
    %c0_i32_1 = arith.constant 0 : i32
    return %c0_i32, %c0_i32_0 : i32, i32
  }
  func.func @transform_8(%arg0: i32) -> (i32, i32) {
    %c0_i32 = arith.constant 0 : i32
    %c0_i32_0 = arith.constant 0 : i32
    %c0_i32_1 = arith.constant 0 : i32
    return %c0_i32, %c0_i32_0 : i32, i32
  }
  func.func @transform_9(%arg0: i32) -> (i32, i32) {
    %c0_i32 = arith.constant 0 : i32
    %c0_i32_0 = arith.constant 0 : i32
    return %arg0, %c0_i32 : i32, i32
  }
  func.func @transform_10(%arg0: i32) -> (i32, i32) {
    %c0_i32 = arith.constant 0 : i32
    %c0_i32_0 = arith.constant 0 : i32
    return %arg0, %c0_i32 : i32, i32
  }
}

</mosaic_0001>

<bundles_post_ra>
// kernel: outblock_forward.1
= control target key start
LH: loop header
LB: loop body
LE: loop exit
PB: predicated region body
PF: predicated region fallthrough
CT: control target
= control target key end

     0   :  { %17 = vsyncpa [#allocation4], 0  ;;  %s3576_s0 = inlined_call_operand.vmem [shape: f32[16,256], index: 0, kind: input, shape index: {}]   ;;  %s3577_s1 = inlined_call_operand.hbm [shape: bf16[256,1024], index: 1, kind: input, shape index: {}]   ;;  %s3578_s2 = inlined_call_operand.vmem [shape: f32[1,1024], index: 2, kind: input, shape index: {}]   ;;  %s3579_s3 = inlined_call_operand.vmem [shape: f32[1,1024], index: 3, kind: input, shape index: {}]   ;;  %s3580_s4 = inlined_call_operand.<no memory space> [shape: f32[1], index: 4, kind: input, shape index: {}]   ;;  %s3581_s5 = inlined_call_operand.vmem [shape: bf16[256,256], index: 5, kind: input, shape index: {}]   ;;  %s3582_s6 = inlined_call_operand.vmem [shape: f32[1,256], index: 6, kind: input, shape index: {}]   ;;  %s3583_s7 = inlined_call_operand.hbm [shape: bf16[256,384], index: 7, kind: input, shape index: {}]   ;;  %s3584_s8 = inlined_call_operand.vmem [shape: f32[1,384], index: 8, kind: input, shape index: {}]   ;;  %s3585_s9 = inlined_call_operand.hbm [shape: f32[16,384], index: 9, kind: output, shape index: {0}]   ;;  %s3586_s10 = inlined_call_operand.vmem [shape: f32[16,1], index: 10, kind: output, shape index: {1}]  }
   0x1   :  { %18 = vsyncpa [#allocation7], 0 }
   0x2   :  { %19 = vsyncpa [#allocation5], 0  ;;  %s26_s15 = sshll.u32 %s3577_s1, 4  ;;  %s3118_s16 = smov [#allocation3]   ;;  %s27_s15 = int_to_ptr.hbm [resolvable:$true] %s26_s15 }
   0x3   :  { %s28_s17 = sshll.u32 %s3118_s16, 4  ;;  %s49_s20 = sshll.u32 %s3583_s7, 4  ;;  %s29_s17 = int_to_ptr.vmem [resolvable:$true] %s28_s17  ;;  %s50_s20 = int_to_ptr.hbm [resolvable:$true] %s49_s20 }
   0x4   :  { %s3119_s21 = smov 512   ;;  %s3120_s22 = smov 32  }
   0x5   :  { %34 = dma.hbm_to_vmem [thread:$0]  %s27_s15, 16384, %s29_s17, [#allocation4], %s3119_s21, %s3119_s21, %s3120_s22  }
   0x6   :  { %s3121_s23 = smov [#allocation6]   ;;  %s3122_s25 = smov 192  }
   0x7   :  { %s51_s24 = sshll.u32 %s3121_s23, 4  ;;  %s3123_s26 = smov 12   ;;  %s52_s24 = int_to_ptr.vmem [resolvable:$true] %s51_s24 }
   0x8   :  { %57 = dma.hbm_to_vmem [thread:$0]  %s50_s20, 6144, %s52_s24, [#allocation7], %s3122_s25, %s3122_s25, %s3123_s26  }
   0x9   :  { %3112 = dma.done.wait [#allocation4], 16384  }
   0xa   :  { %3113 = vsyncadd [#allocation4], 4294950912 }
   0xb   :  { %3114 = dma.done.wait [#allocation7], 6144  }
   0xc   :  { %3115 = vsyncadd [#allocation7], 4294961152  ;;  %v2197_v0 = vld [vmem:[#allocation3 + $0x1c0] sm:$0xf]  ;;  %v2859_v5 = vld [vmem:[#allocation3 + $0x1c4] sm:$0xf] }
   0xd   :  { %v2863_v1 = vld [vmem:[#allocation3 + $0x1dc] sm:$0xf0]  ;;  %v2199_v6 = vld [vmem:[#allocation3 + $0x1e0] sm:$0xf0]  ;;  %s1953_s13 = sshll.u32 %s3585_s9, 4  ;;  %s3125_s14 = smov 384   ;;  %s1954_s13 = int_to_ptr.hbm [resolvable:$true] %s1953_s13 }
   0xe   :  { %v2453_v2 = vld [vmem:[#allocation3 + $0x3c0] sm:$0xf]  ;;  %v2198_v3 = vor.u32 %v2863_v1, %v2197_v0  ;;  %v2202_v8 = vor.u32 %v2859_v5, %v2199_v6  ;;  %v2923_v9 = vld [vmem:[#allocation3 + $0x3c4] sm:$0xf]  ;;  %s3126_s15 = smov 24  }
   0xf   :  { %v2927_v4 = vld [vmem:[#allocation3 + $0x3dc] sm:$0xf0]  ;;  %v2455_v10 = vld [vmem:[#allocation3 + $0x3e0] sm:$0xf0] }
  0x10   :  { %v2454_v7 = vor.u32 %v2927_v4, %v2453_v2  ;;  %v2165_v11 = vld [vmem:[#allocation3 + $0x180] sm:$0xf]  ;;  %860 = vmatpush.bf16.msra.mxu0 %v2198_v3  ;;  %v2458_v12 = vor.u32 %v2923_v9, %v2455_v10  ;;  %888 = vmatpush.bf16.msra.mxu2 %v2202_v8  ;;  %v2851_v18 = vld [vmem:[#allocation3 + $0x184] sm:$0xf] }
  0x11   :  { %v2855_v13 = vld [vmem:[#allocation3 + $0x19c] sm:$0xf0]  ;;  %v2167_v19 = vld [vmem:[#allocation3 + $0x1a0] sm:$0xf0] }
  0x12   :  { %v2421_v14 = vld [vmem:[#allocation3 + $0x380] sm:$0xf]  ;;  %874 = vmatpush.bf16.msra.mxu1 %v2454_v7  ;;  %v2166_v16 = vor.u32 %v2855_v13, %v2165_v11  ;;  %v2915_v20 = vld [vmem:[#allocation3 + $0x384] sm:$0xf]  ;;  %902 = vmatpush.bf16.msra.mxu3 %v2458_v12  ;;  %v2170_v21 = vor.u32 %v2851_v18, %v2167_v19 }
  0x13   :  { %v2919_v15 = vld [vmem:[#allocation3 + $0x39c] sm:$0xf0]  ;;  %v2423_v22 = vld [vmem:[#allocation3 + $0x3a0] sm:$0xf0] }
  0x14   :  { %v2422_v17 = vor.u32 %v2919_v15, %v2421_v14  ;;  %v2133_v23 = vld [vmem:[#allocation3 + $0x140] sm:$0xf]  ;;  %v2426_v25 = vor.u32 %v2915_v20, %v2423_v22  ;;  %v2843_v28 = vld [vmem:[#allocation3 + $0x144] sm:$0xf]  ;;  %861 = vmatpush.bf16.msra.mxu0 %v2166_v16  ;;  %889 = vmatpush.bf16.msra.mxu2 %v2170_v21 }
  0x15   :  { %v2847_v24 = vld [vmem:[#allocation3 + $0x15c] sm:$0xf0]  ;;  %v2135_v30 = vld [vmem:[#allocation3 + $0x160] sm:$0xf0] }
  0x16   :  { %v2389_v26 = vld [vmem:[#allocation3 + $0x340] sm:$0xf]  ;;  %v2134_v29 = vor.u32 %v2847_v24, %v2133_v23  ;;  %v2907_v31 = vld [vmem:[#allocation3 + $0x344] sm:$0xf]  ;;  %875 = vmatpush.bf16.msra.mxu1 %v2422_v17  ;;  %v2138_v34 = vor.u32 %v2843_v28, %v2135_v30  ;;  %903 = vmatpush.bf16.msra.mxu3 %v2426_v25  ;;  %v2205_v28 = vld [vmem:[#allocation3 + $0x1c8] sm:$0xf] }
  0x17   :  { %v2911_v27 = vld [vmem:[#allocation3 + $0x35c] sm:$0xf0]  ;;  %v2391_v32 = vld [vmem:[#allocation3 + $0x360] sm:$0xf0]  ;;  %v2461_v30 = vld [vmem:[#allocation3 + $0x3c8] sm:$0xf] }
  0x18   :  { %v2390_v33 = vor.u32 %v2911_v27, %v2389_v26  ;;  %v2101_v35 = vld [vmem:[#allocation3 + $0x100] sm:$0xf]  ;;  %v2394_v38 = vor.u32 %v2907_v31, %v2391_v32  ;;  %v2835_v40 = vld [vmem:[#allocation3 + $0x104] sm:$0xf]  ;;  %862 = vmatpush.bf16.msra.mxu0 %v2134_v29  ;;  %890 = vmatpush.bf16.msra.mxu2 %v2138_v34  ;;  %v2864_v29 = vld [vmem:[#allocation3 + $0x1e4] sm:$0xf0] }
  0x19   :  { %v2839_v36 = vld [vmem:[#allocation3 + $0x11c] sm:$0xf0]  ;;  %v2103_v41 = vld [vmem:[#allocation3 + $0x120] sm:$0xf0]  ;;  %v2928_v32 = vld [vmem:[#allocation3 + $0x3e4] sm:$0xf0] }
  0x1a   :  { %v2357_v37 = vld [vmem:[#allocation3 + $0x300] sm:$0xf]  ;;  %v2899_v42 = vld [vmem:[#allocation3 + $0x304] sm:$0xf]  ;;  %v2102_v44 = vor.u32 %v2839_v36, %v2101_v35  ;;  %876 = vmatpush.bf16.msra.mxu1 %v2390_v33  ;;  %v2106_v46 = vor.u32 %v2835_v40, %v2103_v41  ;;  %904 = vmatpush.bf16.msra.mxu3 %v2394_v38  ;;  %v2860_v33 = vld [vmem:[#allocation3 + $0x1cc] sm:$0xf]  ;;  %v2206_v40 = vor.u32 %v2864_v29, %v2205_v28 }
  0x1b   :  { %v2903_v39 = vld [vmem:[#allocation3 + $0x31c] sm:$0xf0]  ;;  %v2359_v43 = vld [vmem:[#allocation3 + $0x320] sm:$0xf0]  ;;  %v2207_v34 = vld [vmem:[#allocation3 + $0x1e8] sm:$0xf0] }
  0x1c   :  { %v2358_v45 = vor.u32 %v2903_v39, %v2357_v37  ;;  %v2069_v47 = vld [vmem:[#allocation3 + $0xc0] sm:$0xf]  ;;  %v2362_v50 = vor.u32 %v2899_v42, %v2359_v43  ;;  %v2827_v52 = vld [vmem:[#allocation3 + $0xc4] sm:$0xf]  ;;  %863 = vmatpush.bf16.msra.mxu0 %v2102_v44  ;;  %891 = vmatpush.bf16.msra.mxu2 %v2106_v46  ;;  %v2924_v37 = vld [vmem:[#allocation3 + $0x3cc] sm:$0xf]  ;;  %v2462_v42 = vor.u32 %v2928_v32, %v2461_v30 }
  0x1d   :  { %v2831_v48 = vld [vmem:[#allocation3 + $0xdc] sm:$0xf0]  ;;  %v2071_v53 = vld [vmem:[#allocation3 + $0xe0] sm:$0xf0]  ;;  %v2463_v38 = vld [vmem:[#allocation3 + $0x3e8] sm:$0xf0]  ;;  %v2210_v43 = vor.u32 %v2860_v33, %v2207_v34 }
  0x1e   :  { %v2325_v49 = vld [vmem:[#allocation3 + $0x2c0] sm:$0xf]  ;;  %v2891_v54 = vld [vmem:[#allocation3 + $0x2c4] sm:$0xf]  ;;  %v2070_v56 = vor.u32 %v2831_v48, %v2069_v47  ;;  %877 = vmatpush.bf16.msra.mxu1 %v2358_v45  ;;  %v2074_v58 = vor.u32 %v2827_v52, %v2071_v53  ;;  %905 = vmatpush.bf16.msra.mxu3 %v2362_v50  ;;  %v2173_v41 = vld [vmem:[#allocation3 + $0x188] sm:$0xf]  ;;  %v2466_v47 = vor.u32 %v2924_v37, %v2463_v38 }
  0x1f   :  { %v2895_v51 = vld [vmem:[#allocation3 + $0x2dc] sm:$0xf0]  ;;  %v2327_v55 = vld [vmem:[#allocation3 + $0x2e0] sm:$0xf0]  ;;  %v2856_v44 = vld [vmem:[#allocation3 + $0x1a4] sm:$0xf0] }
  0x20   :  { %v2326_v57 = vor.u32 %v2895_v51, %v2325_v49  ;;  %v2037_v59 = vld [vmem:[#allocation3 + $0x80] sm:$0xf]  ;;  %v2330_v62 = vor.u32 %v2891_v54, %v2327_v55  ;;  %v2819_v0 = vld [vmem:[#allocation3 + $0x84] sm:$0xf]  ;;  %864 = vmatpush.bf16.msra.mxu0 %v2070_v56  ;;  %892 = vmatpush.bf16.msra.mxu2 %v2074_v58  ;;  %v2429_v45 = vld [vmem:[#allocation3 + $0x388] sm:$0xf]  ;;  %v2174_v54 = vor.u32 %v2856_v44, %v2173_v41 }
  0x21   :  { %v2823_v60 = vld [vmem:[#allocation3 + $0x9c] sm:$0xf0]  ;;  %v2039_v1 = vld [vmem:[#allocation3 + $0xa0] sm:$0xf0]  ;;  %v2920_v46 = vld [vmem:[#allocation3 + $0x3a4] sm:$0xf0] }
  0x22   :  { %v2293_v61 = vld [vmem:[#allocation3 + $0x280] sm:$0xf]  ;;  %v2883_v2 = vld [vmem:[#allocation3 + $0x284] sm:$0xf]  ;;  %v2038_v4 = vor.u32 %v2823_v60, %v2037_v59  ;;  %878 = vmatpush.bf16.msra.mxu1 %v2326_v57  ;;  %v2042_v6 = vor.u32 %v2819_v0, %v2039_v1  ;;  %906 = vmatpush.bf16.msra.mxu3 %v2330_v62  ;;  %v2852_v48 = vld [vmem:[#allocation3 + $0x18c] sm:$0xf]  ;;  %v2430_v58 = vor.u32 %v2920_v46, %v2429_v45 }
  0x23   :  { %v2887_v63 = vld [vmem:[#allocation3 + $0x29c] sm:$0xf0]  ;;  %v2295_v3 = vld [vmem:[#allocation3 + $0x2a0] sm:$0xf0]  ;;  %v2175_v49 = vld [vmem:[#allocation3 + $0x1a8] sm:$0xf0] }
  0x24   :  { %v2294_v5 = vor.u32 %v2887_v63, %v2293_v61  ;;  %v2005_v7 = vld [vmem:[#allocation3 + $0x40] sm:$0xf]  ;;  %v2298_v10 = vor.u32 %v2883_v2, %v2295_v3  ;;  %v2811_v12 = vld [vmem:[#allocation3 + $0x44] sm:$0xf]  ;;  %865 = vmatpush.bf16.msra.mxu0 %v2038_v4  ;;  %893 = vmatpush.bf16.msra.mxu2 %v2042_v6  ;;  %v2916_v50 = vld [vmem:[#allocation3 + $0x38c] sm:$0xf]  ;;  %v2178_v59 = vor.u32 %v2852_v48, %v2175_v49 }
  0x25   :  { %v2815_v8 = vld [vmem:[#allocation3 + $0x5c] sm:$0xf0]  ;;  %v2007_v13 = vld [vmem:[#allocation3 + $0x60] sm:$0xf0]  ;;  %v2431_v51 = vld [vmem:[#allocation3 + $0x3a8] sm:$0xf0] }
  0x26   :  { %v2261_v9 = vld [vmem:[#allocation3 + $0x240] sm:$0xf]  ;;  %v2875_v14 = vld [vmem:[#allocation3 + $0x244] sm:$0xf]  ;;  %v2006_v16 = vor.u32 %v2815_v8, %v2005_v7  ;;  %879 = vmatpush.bf16.msra.mxu1 %v2294_v5  ;;  %v2010_v20 = vor.u32 %v2811_v12, %v2007_v13  ;;  %907 = vmatpush.bf16.msra.mxu3 %v2298_v10  ;;  %v70_v53 = vld [vmem:[%s3576_s0 + $0x10] sm:$0xff]  ;;  %v2434_v63 = vor.u32 %v2916_v50, %v2431_v51 }
  0x27   :  { %v2879_v11 = vld [vmem:[#allocation3 + $0x25c] sm:$0xf0]  ;;  %v2263_v15 = vld [vmem:[#allocation3 + $0x260] sm:$0xf0]  ;;  %v2141_v55 = vld [vmem:[#allocation3 + $0x148] sm:$0xf] }
  0x28   :  { %v1973_v17 = vld [vmem:[#allocation3] sm:$0xf]  ;;  %v2262_v19 = vor.u32 %v2879_v11, %v2261_v9  ;;  %v2803_v23 = vld [vmem:[#allocation3 + $0x4] sm:$0xf]  ;;  %v2266_v24 = vor.u32 %v2875_v14, %v2263_v15  ;;  %866 = vmatpush.bf16.msra.mxu0 %v2006_v16  ;;  %894 = vmatpush.bf16.msra.mxu2 %v2010_v20  ;;  %v2848_v56 = vld [vmem:[#allocation3 + $0x164] sm:$0xf0] }
  0x29   :  { %v2807_v18 = vld [vmem:[#allocation3 + $0x1c] sm:$0xf0]  ;;  %v1975_v25 = vld [vmem:[#allocation3 + $0x20] sm:$0xf0]  ;;  %v2397_v60 = vld [vmem:[#allocation3 + $0x348] sm:$0xf]  ;;  %v2142_v6 = vor.u32 %v2848_v56, %v2141_v55 }
  0x2a   :  { %v2229_v21 = vld [vmem:[#allocation3 + $0x200] sm:$0xf]  ;;  %v2867_v26 = vld [vmem:[#allocation3 + $0x204] sm:$0xf]  ;;  %v1974_v31 = vor.u32 %v2807_v18, %v1973_v17  ;;  %880 = vmatpush.bf16.msra.mxu1 %v2262_v19  ;;  %v1978_v36 = vor.u32 %v2803_v23, %v1975_v25  ;;  %908 = vmatpush.bf16.msra.mxu3 %v2266_v24  ;;  %v2912_v61 = vld [vmem:[#allocation3 + $0x364] sm:$0xf0] }
  0x2b   :  { %v2871_v22 = vld [vmem:[#allocation3 + $0x21c] sm:$0xf0]  ;;  %v2231_v27 = vld [vmem:[#allocation3 + $0x220] sm:$0xf0]  ;;  %v2844_v62 = vld [vmem:[#allocation3 + $0x14c] sm:$0xf]  ;;  %v2398_v7 = vor.u32 %v2912_v61, %v2397_v60 }
  0x2c   :  { %v2230_v35 = vor.u32 %v2871_v22, %v2229_v21  ;;  %v2234_v39 = vor.u32 %v2867_v26, %v2231_v27  ;;  %867 = vmatpush.bf16.msra.mxu0 %v1974_v31  ;;  %895 = vmatpush.bf16.msra.mxu2 %v1978_v36  ;;  %v68_v52 = vld [vmem:[%s3576_s0] sm:$0xff]  ;;  %v2143_v0 = vld [vmem:[#allocation3 + $0x168] sm:$0xf0]  ;;  %v71_v2 = vld [vmem:[%s3576_s0 + $0x18] sm:$0xff] }
  0x2d   :  { %v3194_v57 = vpack.c.bf16 %v70_v53, %v68_v52  ;;  %v69_v1 = vld [vmem:[%s3576_s0 + $0x8] sm:$0xff]  ;;  %v2146_v8 = vor.u32 %v2844_v62, %v2143_v0 }
  0x2e   :  { %881 = vmatpush.bf16.msra.mxu1 %v2230_v35  ;;  %909 = vmatpush.bf16.msra.mxu3 %v2234_v39  ;;  %v2908_v3 = vld [vmem:[#allocation3 + $0x34c] sm:$0xf]  ;;  %v3204_v5 = vpack.c.bf16 %v71_v2, %v69_v1  ;;  %v2109_v9 = vld [vmem:[#allocation3 + $0x108] sm:$0xf] }
  0x2f   :  { %868 = vmatmul.bf16.vlgmr.msra.gmra.mxu0 %v3194_v57  ;;  %v2399_v4 = vld [vmem:[#allocation3 + $0x368] sm:$0xf0]  ;;  %896 = vmatmul.bf16.vlgmr.msra.gmra.mxu2 %v3194_v57  ;;  %v2840_v10 = vld [vmem:[#allocation3 + $0x124] sm:$0xf0] }
  0x30   :  { %916 = vmatpush.bf16.msrb.mxu0 %v2206_v40  ;;  %944 = vmatpush.bf16.msrb.mxu2 %v2210_v43  ;;  %v2365_v11 = vld [vmem:[#allocation3 + $0x308] sm:$0xf]  ;;  %v2402_v12 = vor.u32 %v2908_v3, %v2399_v4  ;;  %v2836_v14 = vld [vmem:[#allocation3 + $0x10c] sm:$0xf]  ;;  %v2110_v18 = vor.u32 %v2840_v10, %v2109_v9  ;;  %v2213_v3 = vld [vmem:[#allocation3 + $0x1d0] sm:$0xf] }
  0x31   :  { %v2904_v13 = vld [vmem:[#allocation3 + $0x324] sm:$0xf0]  ;;  %v2111_v15 = vld [vmem:[#allocation3 + $0x128] sm:$0xf0]  ;;  %882 = vmatmul.bf16.vlgmr.msra.gmra.mxu1 %v3204_v5  ;;  %910 = vmatmul.bf16.vlgmr.msra.gmra.mxu3 %v3204_v5  ;;  %v2865_v4 = vld [vmem:[#allocation3 + $0x1ec] sm:$0xf0] }
  0x32   :  { %930 = vmatpush.bf16.msrb.mxu1 %v2462_v42  ;;  %958 = vmatpush.bf16.msrb.mxu3 %v2466_v47  ;;  %v2900_v16 = vld [vmem:[#allocation3 + $0x30c] sm:$0xf]  ;;  %v2366_v19 = vor.u32 %v2904_v13, %v2365_v11  ;;  %v2114_v20 = vor.u32 %v2836_v14, %v2111_v15  ;;  %v2077_v21 = vld [vmem:[#allocation3 + $0xc8] sm:$0xf]  ;;  %v2861_v9 = vld [vmem:[#allocation3 + $0x1d4] sm:$0xf] }
  0x33   :  { %v2367_v17 = vld [vmem:[#allocation3 + $0x328] sm:$0xf0]  ;;  %v2832_v22 = vld [vmem:[#allocation3 + $0xe4] sm:$0xf0]  ;;  %v2215_v10 = vld [vmem:[#allocation3 + $0x1f0] sm:$0xf0] }
  0x34   :  { %917 = vmatpush.bf16.msrb.mxu0 %v2174_v54  ;;  %945 = vmatpush.bf16.msrb.mxu2 %v2178_v59  ;;  %v2333_v23 = vld [vmem:[#allocation3 + $0x2c8] sm:$0xf]  ;;  %v2370_v24 = vor.u32 %v2900_v16, %v2367_v17  ;;  %v2828_v26 = vld [vmem:[#allocation3 + $0xcc] sm:$0xf]  ;;  %v2078_v30 = vor.u32 %v2832_v22, %v2077_v21  ;;  %v2925_v13 = vld [vmem:[#allocation3 + $0x3d4] sm:$0xf]  ;;  %v2214_v16 = vor.u32 %v2865_v4, %v2213_v3 }
  0x35   :  { %v2896_v25 = vld [vmem:[#allocation3 + $0x2e4] sm:$0xf0]  ;;  %v2079_v27 = vld [vmem:[#allocation3 + $0xe8] sm:$0xf0]  ;;  %v2471_v14 = vld [vmem:[#allocation3 + $0x3f0] sm:$0xf0] }
  0x36   :  { %931 = vmatpush.bf16.msrb.mxu1 %v2430_v58  ;;  %959 = vmatpush.bf16.msrb.mxu3 %v2434_v63  ;;  %v2892_v28 = vld [vmem:[#allocation3 + $0x2cc] sm:$0xf]  ;;  %v2334_v31 = vor.u32 %v2896_v25, %v2333_v23  ;;  %v2082_v32 = vor.u32 %v2828_v26, %v2079_v27  ;;  %v2045_v33 = vld [vmem:[#allocation3 + $0x88] sm:$0xf]  ;;  %v2437_v21 = vld [vmem:[#allocation3 + $0x390] sm:$0xf]  ;;  %v2474_v22 = vor.u32 %v2925_v13, %v2471_v14 }
  0x37   :  { %v2335_v29 = vld [vmem:[#allocation3 + $0x2e8] sm:$0xf0]  ;;  %v2824_v34 = vld [vmem:[#allocation3 + $0xa4] sm:$0xf0]  ;;  %v2921_v23 = vld [vmem:[#allocation3 + $0x3ac] sm:$0xf0] }
  0x38   :  { %918 = vmatpush.bf16.msrb.mxu0 %v2142_v6  ;;  %946 = vmatpush.bf16.msrb.mxu2 %v2146_v8  ;;  %v2301_v35 = vld [vmem:[#allocation3 + $0x288] sm:$0xf]  ;;  %v2338_v36 = vor.u32 %v2892_v28, %v2335_v29  ;;  %v2820_v38 = vld [vmem:[#allocation3 + $0x8c] sm:$0xf]  ;;  %v2046_v42 = vor.u32 %v2824_v34, %v2045_v33  ;;  %v2469_v6 = vld [vmem:[#allocation3 + $0x3d0] sm:$0xf]  ;;  %v2438_v29 = vor.u32 %v2921_v23, %v2437_v21 }
  0x39   :  { %v2888_v37 = vld [vmem:[#allocation3 + $0x2a4] sm:$0xf0]  ;;  %v2047_v39 = vld [vmem:[#allocation3 + $0xa8] sm:$0xf0]  ;;  %v2929_v8 = vld [vmem:[#allocation3 + $0x3ec] sm:$0xf0] }
  0x3a   :  { %932 = vmatpush.bf16.msrb.mxu1 %v2398_v7  ;;  %960 = vmatpush.bf16.msrb.mxu3 %v2402_v12  ;;  %v2884_v40 = vld [vmem:[#allocation3 + $0x28c] sm:$0xf]  ;;  %v2302_v43 = vor.u32 %v2888_v37, %v2301_v35  ;;  %v2050_v44 = vor.u32 %v2820_v38, %v2047_v39  ;;  %v2013_v45 = vld [vmem:[#allocation3 + $0x48] sm:$0xf]  ;;  %v2470_v17 = vor.u32 %v2929_v8, %v2469_v6  ;;  %v2183_v25 = vld [vmem:[#allocation3 + $0x1b0] sm:$0xf0] }
  0x3b   :  { %v2303_v41 = vld [vmem:[#allocation3 + $0x2a8] sm:$0xf0]  ;;  %v2816_v46 = vld [vmem:[#allocation3 + $0x64] sm:$0xf0]  ;;  %v2917_v26 = vld [vmem:[#allocation3 + $0x394] sm:$0xf] }
  0x3c   :  { %919 = vmatpush.bf16.msrb.mxu0 %v2110_v18  ;;  %947 = vmatpush.bf16.msrb.mxu2 %v2114_v20  ;;  %v2269_v47 = vld [vmem:[#allocation3 + $0x248] sm:$0xf]  ;;  %v2306_v48 = vor.u32 %v2884_v40, %v2303_v41  ;;  %v2812_v50 = vld [vmem:[#allocation3 + $0x4c] sm:$0xf]  ;;  %v2014_v54 = vor.u32 %v2816_v46, %v2013_v45  ;;  %v2218_v18 = vor.u32 %v2861_v9, %v2215_v10  ;;  %v2857_v20 = vld [vmem:[#allocation3 + $0x1ac] sm:$0xf0] }
  0x3d   :  { %v2880_v49 = vld [vmem:[#allocation3 + $0x264] sm:$0xf0]  ;;  %v2015_v51 = vld [vmem:[#allocation3 + $0x68] sm:$0xf0]  ;;  %v2439_v27 = vld [vmem:[#allocation3 + $0x3b0] sm:$0xf0] }
  0x3e   :  { %933 = vmatpush.bf16.msrb.mxu1 %v2366_v19  ;;  %961 = vmatpush.bf16.msrb.mxu3 %v2370_v24  ;;  %v2876_v52 = vld [vmem:[#allocation3 + $0x24c] sm:$0xf]  ;;  %v1981_v55 = vld [vmem:[#allocation3 + $0x8] sm:$0xf]  ;;  %v2270_v58 = vor.u32 %v2880_v49, %v2269_v47  ;;  %v2018_v59 = vor.u32 %v2812_v50, %v2015_v51  ;;  %v2181_v19 = vld [vmem:[#allocation3 + $0x190] sm:$0xf]  ;;  %v2442_v34 = vor.u32 %v2917_v26, %v2439_v27 }
  0x3f   :  { %v2271_v53 = vld [vmem:[#allocation3 + $0x268] sm:$0xf0]  ;;  %v2808_v56 = vld [vmem:[#allocation3 + $0x24] sm:$0xf0]  ;;  %v2853_v24 = vld [vmem:[#allocation3 + $0x194] sm:$0xf]  ;;  %v2182_v28 = vor.u32 %v2857_v20, %v2181_v19 }
  0x40   :  { %920 = vmatpush.bf16.msrb.mxu0 %v2078_v30  ;;  %948 = vmatpush.bf16.msrb.mxu2 %v2082_v32  ;;  %v2237_v60 = vld [vmem:[#allocation3 + $0x208] sm:$0xf]  ;;  %v2804_v62 = vld [vmem:[#allocation3 + $0xc] sm:$0xf]  ;;  %v2274_v63 = vor.u32 %v2876_v52, %v2271_v53  ;;  %v1982_v7 = vor.u32 %v2808_v56, %v1981_v55  ;;  %v2186_v30 = vor.u32 %v2853_v24, %v2183_v25  ;;  %v2849_v32 = vld [vmem:[#allocation3 + $0x16c] sm:$0xf0] }
  0x41   :  { %v2872_v61 = vld [vmem:[#allocation3 + $0x224] sm:$0xf0]  ;;  %v1983_v0 = vld [vmem:[#allocation3 + $0x28] sm:$0xf0]  ;;  %v2405_v33 = vld [vmem:[#allocation3 + $0x350] sm:$0xf] }
  0x42   :  { %934 = vmatpush.bf16.msrb.mxu1 %v2334_v31  ;;  %962 = vmatpush.bf16.msrb.mxu3 %v2338_v36  ;;  %v2868_v1 = vld [vmem:[#allocation3 + $0x20c] sm:$0xf]  ;;  %v2238_v11 = vor.u32 %v2872_v61, %v2237_v60  ;;  %v1986_v12 = vor.u32 %v2804_v62, %v1983_v0  ;;  %v2149_v31 = vld [vmem:[#allocation3 + $0x150] sm:$0xf]  ;;  %v2845_v36 = vld [vmem:[#allocation3 + $0x154] sm:$0xf] }
  0x43   :  { %v2239_v2 = vld [vmem:[#allocation3 + $0x228] sm:$0xf0]  ;;  %v2913_v35 = vld [vmem:[#allocation3 + $0x36c] sm:$0xf0]  ;;  %v2151_v37 = vld [vmem:[#allocation3 + $0x170] sm:$0xf0]  ;;  %v2150_v40 = vor.u32 %v2849_v32, %v2149_v31 }
  0x44   :  { %921 = vmatpush.bf16.msrb.mxu0 %v2046_v42  ;;  %949 = vmatpush.bf16.msrb.mxu2 %v2050_v44  ;;  %v2242_v15 = vor.u32 %v2868_v1, %v2239_v2  ;;  %v2909_v38 = vld [vmem:[#allocation3 + $0x354] sm:$0xf]  ;;  %v2406_v41 = vor.u32 %v2913_v35, %v2405_v33  ;;  %v2154_v42 = vor.u32 %v2845_v36, %v2151_v37  ;;  %v2841_v44 = vld [vmem:[#allocation3 + $0x12c] sm:$0xf0] }
  0x45   :  { %v2407_v39 = vld [vmem:[#allocation3 + $0x370] sm:$0xf0]  ;;  %v2373_v45 = vld [vmem:[#allocation3 + $0x310] sm:$0xf] }
  0x46   :  { %935 = vmatpush.bf16.msrb.mxu1 %v2302_v43  ;;  %963 = vmatpush.bf16.msrb.mxu3 %v2306_v48  ;;  %v2117_v43 = vld [vmem:[#allocation3 + $0x110] sm:$0xf]  ;;  %v2410_v46 = vor.u32 %v2909_v38, %v2407_v39  ;;  %v2837_v48 = vld [vmem:[#allocation3 + $0x114] sm:$0xf]  ;;  %v2221_v38 = vld [vmem:[#allocation3 + $0x1d8] sm:$0xf] }
  0x47   :  { %v2905_v47 = vld [vmem:[#allocation3 + $0x32c] sm:$0xf0]  ;;  %v2119_v49 = vld [vmem:[#allocation3 + $0x130] sm:$0xf0]  ;;  %v2118_v52 = vor.u32 %v2841_v44, %v2117_v43  ;;  %v2866_v39 = vld [vmem:[#allocation3 + $0x1f4] sm:$0xf0] }
  0x48   :  { %922 = vmatpush.bf16.msrb.mxu0 %v2014_v54  ;;  %950 = vmatpush.bf16.msrb.mxu2 %v2018_v59  ;;  %v2901_v50 = vld [vmem:[#allocation3 + $0x314] sm:$0xf]  ;;  %v2374_v53 = vor.u32 %v2905_v47, %v2373_v45  ;;  %v2122_v54 = vor.u32 %v2837_v48, %v2119_v49  ;;  %v2085_v55 = vld [vmem:[#allocation3 + $0xd0] sm:$0xf]  ;;  %v2862_v43 = vld [vmem:[#allocation3 + $0x1dc] sm:$0xf] }
  0x49   :  { %v2375_v51 = vld [vmem:[#allocation3 + $0x330] sm:$0xf0]  ;;  %v2833_v56 = vld [vmem:[#allocation3 + $0xec] sm:$0xf0]  ;;  %v2223_v44 = vld [vmem:[#allocation3 + $0x1f8] sm:$0xf0] }
  0x4a   :  { %936 = vmatpush.bf16.msrb.mxu1 %v2270_v58  ;;  %964 = vmatpush.bf16.msrb.mxu3 %v2274_v63  ;;  %v2341_v58 = vld [vmem:[#allocation3 + $0x2d0] sm:$0xf]  ;;  %v2378_v59 = vor.u32 %v2901_v50, %v2375_v51  ;;  %v2829_v61 = vld [vmem:[#allocation3 + $0xd4] sm:$0xf]  ;;  %v2086_v1 = vor.u32 %v2833_v56, %v2085_v55  ;;  %v2926_v47 = vld [vmem:[#allocation3 + $0x3dc] sm:$0xf]  ;;  %v2222_v50 = vor.u32 %v2866_v39, %v2221_v38 }
  0x4b   :  { %v2897_v60 = vld [vmem:[#allocation3 + $0x2ec] sm:$0xf0]  ;;  %v2087_v62 = vld [vmem:[#allocation3 + $0xf0] sm:$0xf0]  ;;  %v2479_v48 = vld [vmem:[#allocation3 + $0x3f8] sm:$0xf0] }
  0x4c   :  { %923 = vmatpush.bf16.msrb.mxu0 %v1982_v7  ;;  %951 = vmatpush.bf16.msrb.mxu2 %v1986_v12  ;;  %v2893_v63 = vld [vmem:[#allocation3 + $0x2d4] sm:$0xf]  ;;  %v2342_v2 = vor.u32 %v2897_v60, %v2341_v58  ;;  %v2090_v3 = vor.u32 %v2829_v61, %v2087_v62  ;;  %v2053_v4 = vld [vmem:[#allocation3 + $0x90] sm:$0xf]  ;;  %v2445_v55 = vld [vmem:[#allocation3 + $0x398] sm:$0xf]  ;;  %v2482_v56 = vor.u32 %v2926_v47, %v2479_v48 }
  0x4d   :  { %v2343_v0 = vld [vmem:[#allocation3 + $0x2f0] sm:$0xf0]  ;;  %v2825_v6 = vld [vmem:[#allocation3 + $0xac] sm:$0xf0]  ;;  %v2922_v58 = vld [vmem:[#allocation3 + $0x3b4] sm:$0xf0] }
  0x4e   :  { %937 = vmatpush.bf16.msrb.mxu1 %v2238_v11  ;;  %965 = vmatpush.bf16.msrb.mxu3 %v2242_v15  ;;  %v2309_v7 = vld [vmem:[#allocation3 + $0x290] sm:$0xf]  ;;  %v2346_v8 = vor.u32 %v2893_v63, %v2343_v0  ;;  %v2821_v10 = vld [vmem:[#allocation3 + $0x94] sm:$0xf]  ;;  %v2054_v14 = vor.u32 %v2825_v6, %v2053_v4  ;;  %v2191_v60 = vld [vmem:[#allocation3 + $0x1b8] sm:$0xf0]  ;;  %v2446_v0 = vor.u32 %v2922_v58, %v2445_v55 }
  0x4f   :  { %924 = vmatmul.bf16.vlgmr.msrb.gmra.mxu0 %v3194_v57  ;;  %952 = vmatmul.bf16.vlgmr.msrb.gmra.mxu2 %v3194_v57  ;;  %v2889_v9 = vld [vmem:[#allocation3 + $0x2ac] sm:$0xf0]  ;;  %v2055_v11 = vld [vmem:[#allocation3 + $0xb0] sm:$0xf0]  ;;  %v2918_v61 = vld [vmem:[#allocation3 + $0x39c] sm:$0xf] }
  0x50   :  { %972 = vmatpush.bf16.msra.mxu0 %v2214_v16  ;;  %1000 = vmatpush.bf16.msra.mxu2 %v2218_v18  ;;  %v2885_v12 = vld [vmem:[#allocation3 + $0x294] sm:$0xf]  ;;  %v2310_v15 = vor.u32 %v2889_v9, %v2309_v7  ;;  %v2058_v16 = vor.u32 %v2821_v10, %v2055_v11  ;;  %v2817_v18 = vld [vmem:[#allocation3 + $0x6c] sm:$0xf0]  ;;  %v2447_v62 = vld [vmem:[#allocation3 + $0x3b8] sm:$0xf0] }
  0x51   :  { %938 = vmatmul.bf16.vlgmr.msrb.gmra.mxu1 %v3204_v5  ;;  %966 = vmatmul.bf16.vlgmr.msrb.gmra.mxu3 %v3204_v5  ;;  %v2311_v13 = vld [vmem:[#allocation3 + $0x2b0] sm:$0xf0]  ;;  %v2277_v19 = vld [vmem:[#allocation3 + $0x250] sm:$0xf]  ;;  %v2413_v4 = vld [vmem:[#allocation3 + $0x358] sm:$0xf]  ;;  %v2450_v6 = vor.u32 %v2918_v61, %v2447_v62 }
  0x52   :  { %986 = vmatpush.bf16.msra.mxu1 %v2470_v17  ;;  %1014 = vmatpush.bf16.msra.mxu3 %v2474_v22  ;;  %v2021_v17 = vld [vmem:[#allocation3 + $0x50] sm:$0xf]  ;;  %v2314_v20 = vor.u32 %v2885_v12, %v2311_v13  ;;  %v2813_v22 = vld [vmem:[#allocation3 + $0x54] sm:$0xf]  ;;  %v2914_v7 = vld [vmem:[#allocation3 + $0x374] sm:$0xf0] }
  0x53   :  { %v2881_v21 = vld [vmem:[#allocation3 + $0x26c] sm:$0xf0]  ;;  %v2023_v23 = vld [vmem:[#allocation3 + $0x70] sm:$0xf0]  ;;  %v2022_v26 = vor.u32 %v2817_v18, %v2021_v17  ;;  %v2159_v9 = vld [vmem:[#allocation3 + $0x178] sm:$0xf0]  ;;  %v2414_v13 = vor.u32 %v2914_v7, %v2413_v4 }
  0x54   :  { %973 = vmatpush.bf16.msra.mxu0 %v2182_v28  ;;  %1001 = vmatpush.bf16.msra.mxu2 %v2186_v30  ;;  %v2877_v24 = vld [vmem:[#allocation3 + $0x254] sm:$0xf]  ;;  %v1989_v27 = vld [vmem:[#allocation3 + $0x10] sm:$0xf]  ;;  %v2026_v30 = vor.u32 %v2813_v22, %v2023_v23  ;;  %v2910_v10 = vld [vmem:[#allocation3 + $0x35c] sm:$0xf] }
  0x55   :  { %v2279_v25 = vld [vmem:[#allocation3 + $0x270] sm:$0xf0]  ;;  %v2809_v28 = vld [vmem:[#allocation3 + $0x2c] sm:$0xf0]  ;;  %v2415_v11 = vld [vmem:[#allocation3 + $0x378] sm:$0xf0] }
  0x56   :  { %987 = vmatpush.bf16.msra.mxu1 %v2438_v29  ;;  %1015 = vmatpush.bf16.msra.mxu3 %v2442_v34  ;;  %v2278_v29 = vor.u32 %v2881_v21, %v2277_v19  ;;  %v2245_v31 = vld [vmem:[#allocation3 + $0x210] sm:$0xf]  ;;  %v2805_v33 = vld [vmem:[#allocation3 + $0x14] sm:$0xf]  ;;  %v2282_v34 = vor.u32 %v2877_v24, %v2279_v25  ;;  %v2381_v17 = vld [vmem:[#allocation3 + $0x318] sm:$0xf]  ;;  %v2418_v18 = vor.u32 %v2910_v10, %v2415_v11 }
  0x57   :  { %v2873_v32 = vld [vmem:[#allocation3 + $0x22c] sm:$0xf0]  ;;  %v1991_v35 = vld [vmem:[#allocation3 + $0x30] sm:$0xf0]  ;;  %v2906_v19 = vld [vmem:[#allocation3 + $0x334] sm:$0xf0] }
  0x58   :  { %974 = vmatpush.bf16.msra.mxu0 %v2150_v40  ;;  %1002 = vmatpush.bf16.msra.mxu2 %v2154_v42  ;;  %v2869_v36 = vld [vmem:[#allocation3 + $0x214] sm:$0xf]  ;;  %v2477_v40 = vld [vmem:[#allocation3 + $0x3d8] sm:$0xf]  ;;  %v2246_v45 = vor.u32 %v2873_v32, %v2245_v31  ;;  %v2127_v21 = vld [vmem:[#allocation3 + $0x138] sm:$0xf0]  ;;  %v2382_v25 = vor.u32 %v2906_v19, %v2381_v17 }
  0x59   :  { %v2247_v37 = vld [vmem:[#allocation3 + $0x230] sm:$0xf0]  ;;  %v2930_v42 = vld [vmem:[#allocation3 + $0x3f4] sm:$0xf0]  ;;  %v2902_v22 = vld [vmem:[#allocation3 + $0x31c] sm:$0xf] }
  0x5a   :  { %988 = vmatpush.bf16.msra.mxu1 %v2406_v41  ;;  %1016 = vmatpush.bf16.msra.mxu3 %v2410_v46  ;;  %v1990_v41 = vor.u32 %v2809_v28, %v1989_v27  ;;  %v1994_v46 = vor.u32 %v2805_v33, %v1991_v35  ;;  %v2250_v49 = vor.u32 %v2869_v36, %v2247_v37  ;;  %v2383_v23 = vld [vmem:[#allocation3 + $0x338] sm:$0xf0]  ;;  %v2093_v27 = vld [vmem:[#allocation3 + $0xd8] sm:$0xf]  ;;  %v2541_v10 = vld [vmem:[%s3581_s5 + $0x70] sm:$0xf] }
  0x5b   :  { %v2478_v51 = vor.u32 %v2930_v42, %v2477_v40  ;;  %v2834_v28 = vld [vmem:[#allocation3 + $0xf4] sm:$0xf0]  ;;  %v2830_v32 = vld [vmem:[#allocation3 + $0xdc] sm:$0xf]  ;;  %v2961_v19 = vld [vmem:[%s3581_s5 + $0xf4] sm:$0xf] }
  0x5c   :  { %975 = vmatpush.bf16.msra.mxu0 %v2118_v52  ;;  %1003 = vmatpush.bf16.msra.mxu2 %v2122_v54  ;;  %v2226_v52 = vor.u32 %v2862_v43, %v2223_v44  ;;  %v2858_v54 = vld [vmem:[#allocation3 + $0x1b4] sm:$0xf0]  ;;  %v2095_v33 = vld [vmem:[#allocation3 + $0xf8] sm:$0xf0]  ;;  %v2094_v36 = vor.u32 %v2834_v28, %v2093_v27  ;;  %v2597_v27 = vld [vmem:[%s3581_s5 + $0xe0] sm:$0xf] }
  0x5d   :  { %v2898_v31 = vld [vmem:[#allocation3 + $0x2f4] sm:$0xf0]  ;;  %v2351_v35 = vld [vmem:[#allocation3 + $0x2f8] sm:$0xf0]  ;;  %v2098_v38 = vor.u32 %v2830_v32, %v2095_v33  ;;  %v2959_v32 = vld [vmem:[%s3581_s5 + $0xe4] sm:$0xf] }
  0x5e   :  { %989 = vmatpush.bf16.msra.mxu1 %v2374_v53  ;;  %1017 = vmatpush.bf16.msra.mxu3 %v2378_v59  ;;  %v2189_v53 = vld [vmem:[#allocation3 + $0x198] sm:$0xf]  ;;  %v2854_v59 = vld [vmem:[#allocation3 + $0x19c] sm:$0xf]  ;;  %v2599_v33 = vld [vmem:[%s3581_s5 + $0xe8] sm:$0xf0] }
  0x5f   :  { %v2190_v63 = vor.u32 %v2858_v54, %v2189_v53  ;;  %v2061_v39 = vld [vmem:[#allocation3 + $0x98] sm:$0xf]  ;;  %v2822_v44 = vld [vmem:[#allocation3 + $0x9c] sm:$0xf] }
  0x60   :  { %976 = vmatpush.bf16.msra.mxu0 %v2086_v1  ;;  %1004 = vmatpush.bf16.msra.mxu2 %v2090_v3  ;;  %v2194_v1 = vor.u32 %v2854_v59, %v2191_v60  ;;  %v2850_v3 = vld [vmem:[#allocation3 + $0x174] sm:$0xf0]  ;;  %v2319_v47 = vld [vmem:[#allocation3 + $0x2b8] sm:$0xf0] }
  0x61   :  { %v2826_v40 = vld [vmem:[#allocation3 + $0xb4] sm:$0xf0]  ;;  %v2031_v58 = vld [vmem:[#allocation3 + $0x78] sm:$0xf0] }
  0x62   :  { %990 = vmatpush.bf16.msra.mxu1 %v2342_v2  ;;  %1018 = vmatpush.bf16.msra.mxu3 %v2346_v8  ;;  %v2157_v2 = vld [vmem:[#allocation3 + $0x158] sm:$0xf]  ;;  %v2846_v8 = vld [vmem:[#allocation3 + $0x15c] sm:$0xf]  ;;  %v2062_v48 = vor.u32 %v2826_v40, %v2061_v39  ;;  %v2589_v39 = vld [vmem:[%s3581_s5 + $0xd0] sm:$0xf]  ;;  %v2602_v40 = vor.u32 %v2959_v32, %v2599_v33 }
  0x63   :  { %v2158_v12 = vor.u32 %v2850_v3, %v2157_v2  ;;  %v2890_v43 = vld [vmem:[#allocation3 + $0x2b4] sm:$0xf0]  ;;  %v2878_v59 = vld [vmem:[#allocation3 + $0x25c] sm:$0xf] }
  0x64   :  { %977 = vmatpush.bf16.msra.mxu0 %v2054_v14  ;;  %1005 = vmatpush.bf16.msra.mxu2 %v2058_v16  ;;  %v2162_v14 = vor.u32 %v2846_v8, %v2159_v9  ;;  %v2842_v16 = vld [vmem:[#allocation3 + $0x134] sm:$0xf0]  ;;  %v2287_v60 = vld [vmem:[#allocation3 + $0x278] sm:$0xf0] }
  0x65   :  { %v2285_v53 = vld [vmem:[#allocation3 + $0x258] sm:$0xf]  ;;  %v2806_v4 = vld [vmem:[#allocation3 + $0x1c] sm:$0xf] }
  0x66   :  { %991 = vmatpush.bf16.msra.mxu1 %v2310_v15  ;;  %1019 = vmatpush.bf16.msra.mxu3 %v2314_v20  ;;  %v2125_v15 = vld [vmem:[#allocation3 + $0x118] sm:$0xf]  ;;  %v2838_v20 = vld [vmem:[#allocation3 + $0x11c] sm:$0xf] }
  0x67   :  { %v2126_v24 = vor.u32 %v2842_v16, %v2125_v15  ;;  %v2882_v55 = vld [vmem:[#allocation3 + $0x274] sm:$0xf0]  ;;  %v1999_v7 = vld [vmem:[#allocation3 + $0x38] sm:$0xf0]  ;;  %v2945_v15 = vld [vmem:[%s3581_s5 + $0x74] sm:$0xf] }
  0x68   :  { %978 = vmatpush.bf16.msra.mxu0 %v2022_v26  ;;  %1006 = vmatpush.bf16.msra.mxu2 %v2026_v30  ;;  %v2130_v26 = vor.u32 %v2838_v20, %v2127_v21  ;;  %v2386_v30 = vor.u32 %v2902_v22, %v2383_v23  ;;  %v1997_v62 = vld [vmem:[#allocation3 + $0x18] sm:$0xf]  ;;  %v2870_v8 = vld [vmem:[#allocation3 + $0x21c] sm:$0xf] }
  0x69   :  { %v2253_v2 = vld [vmem:[#allocation3 + $0x218] sm:$0xf]  ;;  %v2255_v9 = vld [vmem:[#allocation3 + $0x238] sm:$0xf0] }
  0x6a   :  { %992 = vmatpush.bf16.msra.mxu1 %v2278_v29  ;;  %1020 = vmatpush.bf16.msra.mxu3 %v2282_v34  ;;  %v2349_v29 = vld [vmem:[#allocation3 + $0x2d8] sm:$0xf]  ;;  %v2894_v34 = vld [vmem:[#allocation3 + $0x2dc] sm:$0xf]  ;;  %v2258_v21 = vor.u32 %v2870_v8, %v2255_v9 }
  0x6b   :  { %v2350_v37 = vor.u32 %v2898_v31, %v2349_v29  ;;  %v2354_v42 = vor.u32 %v2894_v34, %v2351_v35  ;;  %v2874_v3 = vld [vmem:[#allocation3 + $0x234] sm:$0xf0]  ;;  %v2543_v16 = vld [vmem:[%s3581_s5 + $0x78] sm:$0xf0]  ;;  %v2960_v29 = vld [vmem:[%s3581_s5 + $0xe4] sm:$0xf0] }
  0x6c   :  { %979 = vmatpush.bf16.msra.mxu0 %v1990_v41  ;;  %1007 = vmatpush.bf16.msra.mxu2 %v1994_v46  ;;  %v2317_v41 = vld [vmem:[#allocation3 + $0x298] sm:$0xf]  ;;  %v2886_v46 = vld [vmem:[#allocation3 + $0x29c] sm:$0xf]  ;;  %v2254_v17 = vor.u32 %v2874_v3, %v2253_v2  ;;  %v2535_v31 = vld [vmem:[%s3581_s5 + $0x68] sm:$0xf0]  ;;  %v2598_v35 = vor.u32 %v2960_v29, %v2597_v27 }
  0x6d   :  { %v2322_v54 = vor.u32 %v2886_v46, %v2319_v47  ;;  %v2946_v11 = vld [vmem:[%s3581_s5 + $0x74] sm:$0xf0]  ;;  %v2607_v20 = vld [vmem:[%s3581_s5 + $0xf8] sm:$0xf0]  ;;  %v2937_v3 = vld [vmem:[%s3581_s5 + $0x34] sm:$0xf] }
  0x6e   :  { %993 = vmatpush.bf16.msra.mxu1 %v2246_v45  ;;  %1021 = vmatpush.bf16.msra.mxu3 %v2250_v49  ;;  %v2063_v45 = vld [vmem:[#allocation3 + $0xb8] sm:$0xf0]  ;;  %v2318_v49 = vor.u32 %v2890_v43, %v2317_v41  ;;  %v2542_v22 = vor.u32 %v2946_v11, %v2541_v10  ;;  %v2610_v28 = vor.u32 %v2961_v19, %v2607_v20  ;;  %v2958_v41 = vld [vmem:[%s3581_s5 + $0xd4] sm:$0xf0]  ;;  %v2501_v11 = vld [vmem:[%s3581_s5 + $0x20] sm:$0xf] }
  0x6f   :  { %980 = vmatmul.bf16.vlgmr.msra.gmra.mxu0 %v3194_v57  ;;  %1008 = vmatmul.bf16.vlgmr.msra.gmra.mxu2 %v3194_v57  ;;  %v2527_v43 = vld [vmem:[%s3581_s5 + $0x58] sm:$0xf0]  ;;  %v2590_v47 = vor.u32 %v2958_v41, %v2589_v39  ;;  %v2954_v2 = vld [vmem:[%s3581_s5 + $0xb4] sm:$0xf0]  ;;  %v2567_v19 = vld [vmem:[%s3581_s5 + $0xa8] sm:$0xf0] }
  0x70   :  { %1028 = vmatpush.bf16.msrb.mxu0 %v2222_v50  ;;  %1056 = vmatpush.bf16.msrb.mxu2 %v2226_v52  ;;  %v2066_v50 = vor.u32 %v2822_v44, %v2063_v45  ;;  %v2818_v52 = vld [vmem:[#allocation3 + $0x74] sm:$0xf0]  ;;  %v2957_v44 = vld [vmem:[%s3581_s5 + $0xd4] sm:$0xf]  ;;  %v2591_v45 = vld [vmem:[%s3581_s5 + $0xd8] sm:$0xf0] }
  0x71   :  { %994 = vmatmul.bf16.vlgmr.msra.gmra.mxu1 %v3204_v5  ;;  %1022 = vmatmul.bf16.vlgmr.msra.gmra.mxu3 %v3204_v5  ;;  %v2950_v27 = vld [vmem:[%s3581_s5 + $0x94] sm:$0xf0]  ;;  %v2495_v29 = vld [vmem:[%s3581_s5 + $0x18] sm:$0xf0]  ;;  %v2948_v39 = vld [vmem:[%s3581_s5 + $0x84] sm:$0xf0] }
  0x72   :  { %1042 = vmatpush.bf16.msrb.mxu1 %v2478_v51  ;;  %1070 = vmatpush.bf16.msrb.mxu3 %v2482_v56  ;;  %v2029_v51 = vld [vmem:[#allocation3 + $0x58] sm:$0xf]  ;;  %v2814_v56 = vld [vmem:[#allocation3 + $0x5c] sm:$0xf]  ;;  %v2487_v41 = vld [vmem:[%s3581_s5 + $0x8] sm:$0xf0] }
  0x73   :  { %v2030_v61 = vor.u32 %v2818_v52, %v2029_v51  ;;  %v2581_v51 = vld [vmem:[%s3581_s5 + $0xc0] sm:$0xf]  ;;  %v2594_v52 = vor.u32 %v2957_v44, %v2591_v45 }
  0x74   :  { %1029 = vmatpush.bf16.msrb.mxu0 %v2190_v63  ;;  %1057 = vmatpush.bf16.msrb.mxu2 %v2194_v1  ;;  %v2810_v63 = vld [vmem:[#allocation3 + $0x34] sm:$0xf0]  ;;  %v2034_v1 = vor.u32 %v2814_v56, %v2031_v58  ;;  %v2955_v56 = vld [vmem:[%s3581_s5 + $0xc4] sm:$0xf]  ;;  %v2583_v58 = vld [vmem:[%s3581_s5 + $0xc8] sm:$0xf0] }
  0x76   :  { %1043 = vmatpush.bf16.msrb.mxu1 %v2446_v0  ;;  %1071 = vmatpush.bf16.msrb.mxu3 %v2450_v6  ;;  %v2286_v0 = vor.u32 %v2882_v55, %v2285_v53  ;;  %v2290_v6 = vor.u32 %v2878_v59, %v2287_v60  ;;  %v2956_v53 = vld [vmem:[%s3581_s5 + $0xc4] sm:$0xf0]  ;;  %v2519_v55 = vld [vmem:[%s3581_s5 + $0x48] sm:$0xf0] }
  0x77   :  { %v2582_v60 = vor.u32 %v2956_v53, %v2581_v51 }
  0x78   :  { %1030 = vmatpush.bf16.msrb.mxu0 %v2158_v12  ;;  %1058 = vmatpush.bf16.msrb.mxu2 %v2162_v14  ;;  %v2605_v12 = vld [vmem:[%s3581_s5 + $0xf0] sm:$0xf]  ;;  %v2962_v14 = vld [vmem:[%s3581_s5 + $0xf4] sm:$0xf0] }
  0x79   :  { %v2606_v23 = vor.u32 %v2962_v14, %v2605_v12  ;;  %v2936_v12 = vld [vmem:[%s3581_s5 + $0x24] sm:$0xf0] }
  0x7a   :  { %1044 = vmatpush.bf16.msrb.mxu1 %v2414_v13  ;;  %1072 = vmatpush.bf16.msrb.mxu3 %v2418_v18  ;;  %v1998_v13 = vor.u32 %v2810_v63, %v1997_v62  ;;  %v2002_v18 = vor.u32 %v2806_v4, %v1999_v7  ;;  %v2509_v62 = vld [vmem:[%s3581_s5 + $0x30] sm:$0xf]  ;;  %v2938_v63 = vld [vmem:[%s3581_s5 + $0x34] sm:$0xf0]  ;;  %v2511_v4 = vld [vmem:[%s3581_s5 + $0x38] sm:$0xf0]  ;;  %v2502_v20 = vor.u32 %v2936_v12, %v2501_v11 }
  0x7b   :  { %v2575_v7 = vld [vmem:[%s3581_s5 + $0xb8] sm:$0xf0]  ;;  %v2510_v8 = vor.u32 %v2938_v63, %v2509_v62  ;;  %v2514_v10 = vor.u32 %v2937_v3, %v2511_v4  ;;  %v3431_v11 = vld [vmem:[%s3579_s3] sm:$0xff]  ;;  %v2793_v12 = vld [vmem:[#allocation6 + $0x168] sm:$0xf] }
  0x7c   :  { %1031 = vmatpush.bf16.msrb.mxu0 %v2126_v24  ;;  %1059 = vmatpush.bf16.msrb.mxu2 %v2130_v26  ;;  %v2546_v24 = vor.u32 %v2945_v15, %v2543_v16  ;;  %v2944_v26 = vld [vmem:[%s3581_s5 + $0x64] sm:$0xf0]  ;;  %v2935_v16 = vld [vmem:[%s3581_s5 + $0x24] sm:$0xf] }
  0x7d   :  { %v2952_v15 = vld [vmem:[%s3581_s5 + $0xa4] sm:$0xf0] }
  0x7e   :  { %1045 = vmatpush.bf16.msrb.mxu1 %v2382_v25  ;;  %1073 = vmatpush.bf16.msrb.mxu3 %v2386_v30  ;;  %v2533_v25 = vld [vmem:[%s3581_s5 + $0x60] sm:$0xf]  ;;  %v2943_v30 = vld [vmem:[%s3581_s5 + $0x64] sm:$0xf] }
  0x7f   :  { %v2534_v34 = vor.u32 %v2944_v26, %v2533_v25  ;;  %v2557_v25 = vld [vmem:[%s3581_s5 + $0x90] sm:$0xf] }
  0x80   :  { %1032 = vmatpush.bf16.msrb.mxu0 %v2094_v36  ;;  %1060 = vmatpush.bf16.msrb.mxu2 %v2098_v38  ;;  %v2538_v36 = vor.u32 %v2943_v30, %v2535_v31  ;;  %v2942_v38 = vld [vmem:[%s3581_s5 + $0x54] sm:$0xf0]  ;;  %v2949_v30 = vld [vmem:[%s3581_s5 + $0x94] sm:$0xf]  ;;  %v2559_v31 = vld [vmem:[%s3581_s5 + $0x98] sm:$0xf0]  ;;  %v2558_v33 = vor.u32 %v2950_v27, %v2557_v25 }
  0x81   :  { %v3006_v27 = vld [vmem:[#allocation6 + $0x158] sm:$0xf0] }
  0x82   :  { %1046 = vmatpush.bf16.msrb.mxu1 %v2350_v37  ;;  %1074 = vmatpush.bf16.msrb.mxu3 %v2354_v42  ;;  %v2525_v37 = vld [vmem:[%s3581_s5 + $0x50] sm:$0xf]  ;;  %v2941_v42 = vld [vmem:[%s3581_s5 + $0x54] sm:$0xf] }
  0x83   :  { %v2526_v46 = vor.u32 %v2942_v38, %v2525_v37  ;;  %v2549_v37 = vld [vmem:[%s3581_s5 + $0x80] sm:$0xf]  ;;  %v2562_v38 = vor.u32 %v2949_v30, %v2559_v31 }
  0x84   :  { %1033 = vmatpush.bf16.msrb.mxu0 %v2062_v48  ;;  %1061 = vmatpush.bf16.msrb.mxu2 %v2066_v50  ;;  %v2530_v48 = vor.u32 %v2941_v42, %v2527_v43  ;;  %v2940_v50 = vld [vmem:[%s3581_s5 + $0x44] sm:$0xf0]  ;;  %v2947_v42 = vld [vmem:[%s3581_s5 + $0x84] sm:$0xf]  ;;  %v2551_v43 = vld [vmem:[%s3581_s5 + $0x88] sm:$0xf0]  ;;  %v2550_v45 = vor.u32 %v2948_v39, %v2549_v37 }
  0x85   :  { %v2661_v37 = vld [vmem:[#allocation6 + $0x60] sm:$0xf] }
  0x86   :  { %1047 = vmatpush.bf16.msrb.mxu1 %v2318_v49  ;;  %1075 = vmatpush.bf16.msrb.mxu3 %v2322_v54  ;;  %v2517_v49 = vld [vmem:[%s3581_s5 + $0x40] sm:$0xf]  ;;  %v2939_v54 = vld [vmem:[%s3581_s5 + $0x44] sm:$0xf] }
  0x87   :  { %v2518_v59 = vor.u32 %v2940_v50, %v2517_v49 }
  0x88   :  { %1034 = vmatpush.bf16.msrb.mxu0 %v2030_v61  ;;  %1062 = vmatpush.bf16.msrb.mxu2 %v2034_v1  ;;  %v2522_v61 = vor.u32 %v2939_v54, %v2519_v55  ;;  %v2586_v1 = vor.u32 %v2955_v56, %v2583_v58 }
  0x8a   :  { %1048 = vmatpush.bf16.msrb.mxu1 %v2286_v0  ;;  %1076 = vmatpush.bf16.msrb.mxu3 %v2290_v6  ;;  %v2573_v0 = vld [vmem:[%s3581_s5 + $0xb0] sm:$0xf]  ;;  %v2953_v6 = vld [vmem:[%s3581_s5 + $0xb4] sm:$0xf] }
  0x8b   :  { %v2574_v9 = vor.u32 %v2954_v2, %v2573_v0  ;;  %v2578_v14 = vor.u32 %v2953_v6, %v2575_v7  ;;  %v2685_v6 = vld [vmem:[#allocation6 + $0x90] sm:$0xf]  ;;  %v2982_v7 = vld [vmem:[#allocation6 + $0x98] sm:$0xf0] }
  0x8c   :  { %1035 = vmatpush.bf16.msrb.mxu0 %v1998_v13  ;;  %1063 = vmatpush.bf16.msrb.mxu2 %v2002_v18  ;;  %v2565_v13 = vld [vmem:[%s3581_s5 + $0xa0] sm:$0xf]  ;;  %v2951_v18 = vld [vmem:[%s3581_s5 + $0xa4] sm:$0xf] }
  0x8d   :  { %v2570_v26 = vor.u32 %v2951_v18, %v2567_v19  ;;  %v2673_v19 = vld [vmem:[#allocation6 + $0x78] sm:$0xf] }
  0x8e   :  { %1049 = vmatpush.bf16.msrb.mxu1 %v2254_v17  ;;  %1077 = vmatpush.bf16.msrb.mxu3 %v2258_v21  ;;  %v2503_v17 = vld [vmem:[%s3581_s5 + $0x28] sm:$0xf0]  ;;  %v2566_v21 = vor.u32 %v2952_v15, %v2565_v13  ;;  %v3009_v13 = vld [vmem:[#allocation6 + $0x170] sm:$0xf0] }
  0x8f   :  { %1036 = vmatmul.bf16.vlgmr.msrb.gmra.mxu0 %v3194_v57  ;;  %1064 = vmatmul.bf16.vlgmr.msrb.gmra.mxu2 %v3194_v57 }
  0x90   :  { %1391 = vmatpush.bf16.msra.mxu0 %v2542_v22  ;;  %1419 = vmatpush.bf16.msra.mxu2 %v2546_v24  ;;  %v2506_v22 = vor.u32 %v2935_v16, %v2503_v17  ;;  %v2934_v24 = vld [vmem:[%s3581_s5 + $0x14] sm:$0xf0]  ;;  %v2794_v16 = vor.u32 %v3009_v13, %v2793_v12  ;;  %v2637_v13 = vld [vmem:[#allocation6 + $0x30] sm:$0xf] }
  0x91   :  { %1050 = vmatmul.bf16.vlgmr.msrb.gmra.mxu1 %v3204_v5  ;;  %1078 = vmatmul.bf16.vlgmr.msrb.gmra.mxu3 %v3204_v5 }
  0x92   :  { %1405 = vmatpush.bf16.msra.mxu1 %v2606_v23  ;;  %1433 = vmatpush.bf16.msra.mxu3 %v2610_v28  ;;  %v2493_v23 = vld [vmem:[%s3581_s5 + $0x10] sm:$0xf]  ;;  %v2933_v28 = vld [vmem:[%s3581_s5 + $0x14] sm:$0xf] }
  0x93   :  { %v2494_v32 = vor.u32 %v2934_v24, %v2493_v23  ;;  %v1135_v24 = vperm.slane %v3431_v11, 1 }
  0x94   :  { %1392 = vmatpush.bf16.msra.mxu0 %v2534_v34  ;;  %1420 = vmatpush.bf16.msra.mxu2 %v2538_v36  ;;  %v2498_v34 = vor.u32 %v2933_v28, %v2495_v29  ;;  %v2932_v36 = vld [vmem:[%s3581_s5 + $0x4] sm:$0xf0]  ;;  %v1136_v29 = vperm.slane %v3431_v11, 2 }
  0x96   :  { %1406 = vmatpush.bf16.msra.mxu1 %v2598_v35  ;;  %1434 = vmatpush.bf16.msra.mxu3 %v2602_v40  ;;  %v2485_v35 = vld [vmem:[%s3581_s5] sm:$0xf]  ;;  %v2931_v40 = vld [vmem:[%s3581_s5 + $0x4] sm:$0xf] }
  0x97   :  { %v2486_v44 = vor.u32 %v2932_v36, %v2485_v35 }
  0x98   :  { %1393 = vmatpush.bf16.msra.mxu0 %v2526_v46  ;;  %1421 = vmatpush.bf16.msra.mxu2 %v2530_v48  ;;  %v2490_v46 = vor.u32 %v2931_v40, %v2487_v41  ;;  %v2976_v41 = vld [vmem:[#allocation6 + $0x68] sm:$0xf0] }
  0x9a   :  { %1407 = vmatpush.bf16.msra.mxu1 %v2590_v47  ;;  %1435 = vmatpush.bf16.msra.mxu3 %v2594_v52  ;;  %v2554_v47 = vor.u32 %v2947_v42, %v2551_v43  ;;  %v2662_v43 = vor.u32 %v2976_v41, %v2661_v37  ;;  %v3005_v37 = vld [vmem:[#allocation6 + $0x154] sm:$0xf]  ;;  %v2783_v41 = vld [vmem:[#allocation6 + $0x15c] sm:$0xf0] }
  0x9c   :  { %1394 = vmatpush.bf16.msra.mxu0 %v2518_v59  ;;  %1422 = vmatpush.bf16.msra.mxu2 %v2522_v61  ;;  %v3419_v59 = vld [vmem:[%s3578_s2] sm:$0xff]  ;;  %v2985_v61 = vld [vmem:[#allocation6 + $0xb0] sm:$0xf0] }
  0x9d   :  { %v206_v3 = vperm.slane %v3419_v59, 2  ;;  %v207_v25 = vperm.slane %v3419_v59, 3  ;;  %v208_v39 = vperm.slane %v3419_v59, 4 }
  0x9e   :  { %1408 = vmatpush.bf16.msra.mxu1 %v2582_v60  ;;  %1436 = vmatpush.bf16.msra.mxu3 %v2586_v1  ;;  %v204_v60 = vperm.slane %v3419_v59, 0 }
  0xa0   :  { %1395 = vmatpush.bf16.msra.mxu0 %v2510_v8  ;;  %1423 = vmatpush.bf16.msra.mxu2 %v2514_v10  ;;  %v2686_v10 = vor.u32 %v2982_v7, %v2685_v6 }
  0xa2   :  { %1409 = vmatpush.bf16.msra.mxu1 %v2574_v9  ;;  %1437 = vmatpush.bf16.msra.mxu3 %v2578_v14 }
  0xa4   :  { %1396 = vmatpush.bf16.msra.mxu0 %v2502_v20  ;;  %1424 = vmatpush.bf16.msra.mxu2 %v2506_v22  ;;  %v2979_v20 = vld [vmem:[#allocation6 + $0x80] sm:$0xf0] }
  0xa5   :  { %v2674_v23 = vor.u32 %v2979_v20, %v2673_v19  ;;  %v2978_v20 = vld [vmem:[#allocation6 + $0x7c] sm:$0xf] }
  0xa6   :  { %1410 = vmatpush.bf16.msra.mxu1 %v2566_v21  ;;  %1438 = vmatpush.bf16.msra.mxu3 %v2570_v26  ;;  %v1134_v21 = vperm.slane %v3431_v11, 0  ;;  %v2781_v26 = vld [vmem:[#allocation6 + $0x150] sm:$0xf] }
  0xa7   :  { %v2782_v31 = vor.u32 %v3006_v27, %v2781_v26  ;;  %v2745_v26 = vld [vmem:[#allocation6 + $0x108] sm:$0xf]  ;;  %v2997_v27 = vld [vmem:[#allocation6 + $0x110] sm:$0xf0] }
  0xa8   :  { %1397 = vmatpush.bf16.msra.mxu0 %v2494_v32  ;;  %1425 = vmatpush.bf16.msra.mxu2 %v2498_v34 }
  0xaa   :  { %1411 = vmatpush.bf16.msra.mxu1 %v2558_v33  ;;  %1439 = vmatpush.bf16.msra.mxu3 %v2562_v38  ;;  %v1137_v38 = vperm.slane %v3431_v11, 3 }
  0xac   :  { %1398 = vmatpush.bf16.msra.mxu0 %v2486_v44  ;;  %1426 = vmatpush.bf16.msra.mxu2 %v2490_v46  ;;  %v869_v48 = vpop.f32.mrf.mxu0  ;;  %v2984_v44 = vld [vmem:[#allocation6 + $0xac] sm:$0xf]  ;;  %v2769_v46 = vld [vmem:[#allocation6 + $0x138] sm:$0xf] }
  0xad   :  { %v870_v1 = vadd.f32 %v869_v48, %v204_v60 }
  0xae   :  { %1412 = vmatpush.bf16.msra.mxu1 %v2550_v45  ;;  %1440 = vmatpush.bf16.msra.mxu3 %v2554_v47  ;;  %v883_v49 = vpop.f32.mrf.mxu1  ;;  %v2699_v45 = vld [vmem:[#allocation6 + $0xb4] sm:$0xf0] }
  0xaf   :  { %1399 = vmatmul.bf16.vlgmr.msra.gmra.mxu0 %v3194_v57  ;;  %1427 = vmatmul.bf16.vlgmr.msra.gmra.mxu2 %v3194_v57  ;;  %v205_v57 = vperm.slane %v3419_v59, 1  ;;  %v884_v14 = vadd.f32 %v883_v49, %v870_v1  ;;  %v2702_v49 = vor.u32 %v2984_v44, %v2699_v45  ;;  %v1139_v45 = vperm.slane %v3431_v11, 5 }
  0xb1   :  { %1413 = vmatmul.bf16.vlgmr.msra.gmra.mxu1 %v3204_v5  ;;  %1441 = vmatmul.bf16.vlgmr.msra.gmra.mxu3 %v3204_v5  ;;  %v2697_v5 = vld [vmem:[#allocation6 + $0xa8] sm:$0xf]  ;;  %vm1084_vm0 = vcmp.ge.f32.partialorder %v884_v14, 0.0  ;;  %v1100_v32 = vmul.f32 0.01, %v884_v14 }
  0xb2   :  { %v897_v50 = vpop.f32.mrf.mxu2  ;;  %v2698_v63 = vor.u32 %v2985_v61, %v2697_v5  ;;  %1803 = vmatpush.bf16.msrb.mxu1 %v2794_v16  ;;  %1817 = vmatpush.bf16.msrb.mxu2 %v2702_v49  ;;  %v2981_v5 = vld [vmem:[#allocation6 + $0x94] sm:$0xf]  ;;  %v2687_v61 = vld [vmem:[#allocation6 + $0x9c] sm:$0xf0]  ;;  %v1138_v16 = vperm.slane %v3431_v11, 4 }
  0xb3   :  { %v898_v2 = vadd.f32 %v897_v50, %v205_v57  ;;  %v3003_v50 = vld [vmem:[#allocation6 + $0x140] sm:$0xf0]  ;;  %v2690_v1 = vor.u32 %v2981_v5, %v2687_v61  ;;  %v210_v5 = vperm.slane %v3419_v59, 6 }
  0xb4   :  { %v911_v51 = vpop.f32.mrf.mxu3  ;;  %v871_v52 = vpop.f32.mrf.mxu0  ;;  %1789 = vmatpush.bf16.msrb.mxu0 %v2698_v63 }
  0xb5   :  { %v872_v8 = vadd.f32 %v871_v52, %v204_v60  ;;  %v912_v17 = vadd.f32 %v911_v51, %v898_v2  ;;  %v1116_v51 = vsel %vm1084_vm0, %v884_v14, %v1100_v32  ;;  %v209_v60 = vperm.slane %v3419_v59, 5  ;;  %v2757_v2 = vld [vmem:[#allocation6 + $0x120] sm:$0xf]  ;;  %v2970_v14 = vld [vmem:[#allocation6 + $0x38] sm:$0xf0] }
  0xb6   :  { %v885_v53 = vpop.f32.mrf.mxu1  ;;  %1804 = vmatpush.bf16.msrb.mxu1 %v2782_v31  ;;  %v1150_v6 = vmul.f32 %v1134_v21, %v1116_v51  ;;  %v2638_v19 = vor.u32 %v2970_v14, %v2637_v13  ;;  %1818 = vmatpush.bf16.msrb.mxu2 %v2690_v1  ;;  %v2771_v1 = vld [vmem:[#allocation6 + $0x144] sm:$0xf0]  ;;  %v2972_v14 = vld [vmem:[#allocation6 + $0x4c] sm:$0xf] }
  0xb7   :  { %v3434_v22 = vadd.f32 %v885_v53, %v872_v8  ;;  %v1101_v33 = vmul.f32 0.01, %v912_v17  ;;  %vm1085_vm1 = vcmp.ge.f32.partialorder %v912_v17, 0.0 }
  0xb8   :  { %1790 = vmatpush.bf16.msrb.mxu0 %v2686_v10 }
  0xb9   :  { %vm1092_vm2 = vcmp.ge.f32.partialorder %v3434_v22, 0.0  ;;  %v3445_v47 = vmul.f32 0.01, %v3434_v22  ;;  %v1117_v52 = vsel %vm1085_vm1, %v912_v17, %v1101_v33 }
  0xba   :  { %v899_v54 = vpop.f32.mrf.mxu2  ;;  %v1151_v7 = vmul.f32 %v1135_v24, %v1117_v52 }
  0xbb   :  { %v900_v15 = vadd.f32 %v899_v54, %v205_v57  ;;  %v2770_v54 = vor.u32 %v3003_v50, %v2769_v46  ;;  %v2625_v46 = vld [vmem:[#allocation6 + $0x18] sm:$0xf] }
  0xbc   :  { %v913_v55 = vpop.f32.mrf.mxu3  ;;  %1791 = vmatpush.bf16.msrb.mxu0 %v2674_v23  ;;  %v1166_v44 = vadd.f32 %v1151_v7, %v1150_v6  ;;  %v2964_v6 = vld [vmem:[#allocation6 + $0x8] sm:$0xf0] }
  0xbd   :  { %v3438_v28 = vadd.f32 %v913_v55, %v900_v15  ;;  %v2649_v55 = vld [vmem:[#allocation6 + $0x48] sm:$0xf]  ;;  %1805 = vmatpush.bf16.msrb.mxu1 %v2770_v54 }
  0xbf   :  { %vm1093_vm3 = vcmp.ge.f32.partialorder %v3438_v28, 0.0  ;;  %v1109_v15 = vmul.f32 0.01, %v3438_v28 }
  0xc0   :  { %1792 = vmatpush.bf16.msrb.mxu0 %v2662_v43  ;;  %v2786_v43 = vor.u32 %v3005_v37, %v2783_v41 }
  0xc1   :  { %v1125_v49 = vsel %vm1093_vm3, %v3438_v28, %v1109_v15  ;;  %v2705_v15 = vld [vmem:[#allocation6 + $0xb0] sm:$0xf] }
  0xc2   :  { %v1159_v7 = vmul.f32 %v1135_v24, %v1125_v49  ;;  %v2986_v24 = vld [vmem:[#allocation6 + $0xb8] sm:$0xf0]  ;;  %v2693_v49 = vld [vmem:[#allocation6 + $0x98] sm:$0xf] }
  0xcc   :  { %v925_v56 = vpop.f32.mrf.mxu0 }
  0xcd   :  { %v926_v18 = vadd.f32 %v925_v56, %v206_v3  ;;  %v2973_v56 = vld [vmem:[#allocation6 + $0x50] sm:$0xf0] }
  0xce   :  { %v939_v58 = vpop.f32.mrf.mxu1  ;;  %v2650_v57 = vor.u32 %v2973_v56, %v2649_v55  ;;  %v2733_v56 = vld [vmem:[#allocation6 + $0xf0] sm:$0xf] }
  0xcf   :  { %v940_v34 = vadd.f32 %v939_v58, %v926_v18 }
  0xd0   :  { %1793 = vmatpush.bf16.msrb.mxu0 %v2650_v57 }
  0xd1   :  { %v1102_v53 = vmul.f32 0.01, %v940_v34  ;;  %vm1086_vm4 = vcmp.ge.f32.partialorder %v940_v34, 0.0 }
  0xd2   :  { %v953_v62 = vpop.f32.mrf.mxu2 }
  0xd3   :  { %v954_v42 = vadd.f32 %v953_v62, %v207_v25  ;;  %v1118_v23 = vsel %vm1086_vm4, %v940_v34, %v1102_v53  ;;  %vm1190_vm4 = vcmask 7168  }
  0xd4   :  { %v3423_v0 = vpop.f32.mrf.mxu3  ;;  %v927_v4 = vpop.f32.mrf.mxu0  ;;  %1794 = vmatpush.bf16.msrb.mxu0 %v2638_v19  ;;  %v1152_v50 = vmul.f32 %v1136_v29, %v1118_v23 }
  0xd5   :  { %v928_v48 = vadd.f32 %v927_v4, %v206_v3  ;;  %v968_v62 = vadd.f32 %v3423_v0, %v954_v42  ;;  %v3000_v3 = vld [vmem:[#allocation6 + $0x128] sm:$0xf0]  ;;  %v2795_v0 = vld [vmem:[#allocation6 + $0x174] sm:$0xf0] }
  0xd6   :  { %v3426_v9 = vpop.f32.mrf.mxu1  ;;  %v3008_v4 = vld [vmem:[#allocation6 + $0x16c] sm:$0xf]  ;;  %v2758_v12 = vor.u32 %v3000_v3, %v2757_v2  ;;  %v211_v2 = vperm.slane %v3419_v59, 7 }
  0xd7   :  { %v3459_v8 = vadd.f32 %v3426_v9, %v928_v48  ;;  %v2798_v18 = vor.u32 %v3008_v4, %v2795_v0  ;;  %v2675_v9 = vld [vmem:[#allocation6 + $0x84] sm:$0xf0]  ;;  %vm1087_vm5 = vcmp.ge.f32.partialorder %v968_v62, 0.0  ;;  %v2967_v48 = vld [vmem:[#allocation6 + $0x20] sm:$0xf0] }
  0xd8   :  { %1806 = vmatpush.bf16.msrb.mxu1 %v2758_v12  ;;  %v2678_v33 = vor.u32 %v2978_v20, %v2675_v9  ;;  %v2626_v52 = vor.u32 %v2967_v48, %v2625_v46  ;;  %v2613_v4 = vld [vmem:[#allocation6] sm:$0xf]  ;;  %v2721_v9 = vld [vmem:[#allocation6 + $0xd8] sm:$0xf]  ;;  %v2969_v46 = vld [vmem:[#allocation6 + $0x34] sm:$0xf] }
  0xd9   :  { %1831 = vmatpush.bf16.msrb.mxu3 %v2798_v18  ;;  %v3467_v42 = vmul.f32 0.01, %v3459_v8  ;;  %vm1094_vm6 = vcmp.ge.f32.partialorder %v3459_v8, 0.0  ;;  %v2614_v13 = vor.u32 %v2964_v6, %v2613_v4  ;;  %v2639_v48 = vld [vmem:[#allocation6 + $0x3c] sm:$0xf0] }
  0xda   :  { %v955_v30 = vpop.f32.mrf.mxu2  ;;  %1819 = vmatpush.bf16.msrb.mxu2 %v2678_v33  ;;  %1795 = vmatpush.bf16.msrb.mxu0 %v2626_v52 }
  0xdb   :  { %v956_v58 = vadd.f32 %v955_v30, %v207_v25  ;;  %v1103_v30 = vmul.f32 0.01, %v968_v62 }
  0xdc   :  { %v969_v35 = vpop.f32.mrf.mxu3 }
  0xdd   :  { %v3464_v25 = vadd.f32 %v969_v35, %v956_v58  ;;  %v1119_v53 = vsel %vm1087_vm5, %v968_v62, %v1103_v30  ;;  %1832 = vmatpush.bf16.msrb.mxu3 %v2786_v43  ;;  %v2994_v58 = vld [vmem:[#allocation6 + $0xf8] sm:$0xf0]  ;;  %v1126_v43 = vsel %vm1094_vm6, %v3459_v8, %v3467_v42 }
  0xde   :  { %v2734_v61 = vor.u32 %v2994_v58, %v2733_v56  ;;  %v1153_v12 = vmul.f32 %v1137_v38, %v1119_v53  ;;  %1796 = vmatpush.bf16.msrb.mxu0 %v2614_v13  ;;  %v2709_v53 = vld [vmem:[#allocation6 + $0xc0] sm:$0xf] }
  0xdf   :  { %v3483_v51 = vmul.f32 0.01, %v3464_v25  ;;  %vm1095_vm7 = vcmp.ge.f32.partialorder %v3464_v25, 0.0 }
  0xec   :  { %v981_v36 = vpop.f32.mrf.mxu0 }
  0xed   :  { %v982_v63 = vadd.f32 %v981_v36, %v208_v39  ;;  %v2746_v36 = vor.u32 %v2997_v27, %v2745_v26  ;;  %v2991_v26 = vld [vmem:[#allocation6 + $0xe0] sm:$0xf0] }
  0xee   :  { %v995_v40 = vpop.f32.mrf.mxu1  ;;  %v2722_v33 = vor.u32 %v2991_v26, %v2721_v9  ;;  %v2735_v9 = vld [vmem:[#allocation6 + $0xfc] sm:$0xf0]  ;;  %v2789_v26 = vld [vmem:[#allocation6 + $0x158] sm:$0xf] }
  0xef   :  { %v996_v31 = vadd.f32 %v995_v40, %v982_v63  ;;  %v1124_v40 = vsel %vm1092_vm2, %v3434_v22, %v3445_v47  ;;  %v2975_v22 = vld [vmem:[#allocation6 + $0x64] sm:$0xf]  ;;  %v2663_v47 = vld [vmem:[#allocation6 + $0x6c] sm:$0xf0]  ;;  %1807 = vmatpush.bf16.msrb.mxu1 %v2746_v36  ;;  %v3002_v63 = vld [vmem:[#allocation6 + $0x13c] sm:$0xf] }
  0xf0   :  { %v2666_v28 = vor.u32 %v2975_v22, %v2663_v47  ;;  %v1158_v62 = vmul.f32 %v1134_v21, %v1124_v40  ;;  %v2774_v3 = vor.u32 %v3002_v63, %v2771_v1  ;;  %v2651_v21 = vld [vmem:[#allocation6 + $0x54] sm:$0xf0]  ;;  %v2999_v36 = vld [vmem:[#allocation6 + $0x124] sm:$0xf]  ;;  %v2642_v22 = vor.u32 %v2969_v46, %v2639_v48  ;;  %v2801_v1 = vld [vmem:[#allocation6 + $0x170] sm:$0xf] }
  0xf1   :  { %v1104_v54 = vmul.f32 0.01, %v996_v31  ;;  %vm1088_vm8 = vcmp.ge.f32.partialorder %v996_v31, 0.0  ;;  %v2654_v23 = vor.u32 %v2972_v14, %v2651_v21  ;;  %v2983_v47 = vld [vmem:[#allocation6 + $0xa0] sm:$0xf0] }
  0xf2   :  { %v1009_v10 = vpop.f32.mrf.mxu2  ;;  %1820 = vmatpush.bf16.msrb.mxu2 %v2666_v28  ;;  %1833 = vmatpush.bf16.msrb.mxu3 %v2774_v3  ;;  %v2694_v42 = vor.u32 %v2983_v47, %v2693_v49  ;;  %v2747_v63 = vld [vmem:[#allocation6 + $0x114] sm:$0xf0] }
  0xf3   :  { %v1010_v34 = vadd.f32 %v1009_v10, %v209_v60  ;;  %v1167_v10 = vadd.f32 %v1166_v44, %v1152_v50  ;;  %1808 = vmatpush.bf16.msrb.mxu1 %v2734_v61  ;;  %v3516_v50 = vadd.f32 %v1159_v7, %v1158_v62  ;;  %v2996_v61 = vld [vmem:[#allocation6 + $0x10c] sm:$0xf]  ;;  %v1127_v62 = vsel %vm1095_vm7, %v3464_v25, %v3483_v51  ;;  %v2966_v7 = vld [vmem:[#allocation6 + $0x1c] sm:$0xf] }
  0xf4   :  { %v1023_v17 = vpop.f32.mrf.mxu3  ;;  %v983_v32 = vpop.f32.mrf.mxu0  ;;  %v2750_v6 = vor.u32 %v2996_v61, %v2747_v63  ;;  %v2980_v25 = vld [vmem:[#allocation6 + $0x88] sm:$0xf0]  ;;  %v2657_v63 = vld [vmem:[#allocation6 + $0x50] sm:$0xf] }
  0xf5   :  { %v984_v55 = vadd.f32 %v983_v32, %v208_v39  ;;  %v3489_v57 = vadd.f32 %v1023_v17, %v1010_v34  ;;  %v1140_v39 = vperm.slane %v3431_v11, 6  ;;  %v1120_v17 = vsel %vm1088_vm8, %v996_v31, %v1104_v54  ;;  %v2759_v31 = vld [vmem:[#allocation6 + $0x12c] sm:$0xf0]  ;;  %v2988_v54 = vld [vmem:[#allocation6 + $0xc8] sm:$0xf0] }
  0xf6   :  { %v997_v35 = vpop.f32.mrf.mxu1  ;;  %v2706_v32 = vor.u32 %v2986_v24, %v2705_v15  ;;  %v1141_v34 = vperm.slane %v3431_v11, 7  ;;  %v1154_v44 = vmul.f32 %v1138_v16, %v1120_v17  ;;  %1821 = vmatpush.bf16.msrb.mxu2 %v2654_v23  ;;  %v1168_v52 = vadd.f32 %v1167_v10, %v1153_v12  ;;  %v2627_v10 = vld [vmem:[#allocation6 + $0x24] sm:$0xf0]  ;;  %v2681_v15 = vld [vmem:[#allocation6 + $0x80] sm:$0xf] }
  0xf7   :  { %v3501_v18 = vadd.f32 %v997_v35, %v984_v55  ;;  %vm1089_vm9 = vcmp.ge.f32.partialorder %v3489_v57, 0.0  ;;  %v1105_v37 = vmul.f32 0.01, %v3489_v57  ;;  %v2762_v35 = vor.u32 %v2999_v36, %v2759_v31  ;;  %1809 = vmatpush.bf16.msrb.mxu1 %v2722_v33  ;;  %v2993_v24 = vld [vmem:[#allocation6 + $0xf4] sm:$0xf] }
  0xf8   :  { %1845 = vmatpush.bf16.msra.mxu0 %v2706_v32  ;;  %v1160_v55 = vmul.f32 %v1136_v29, %v1126_v43  ;;  %v2710_v58 = vor.u32 %v2988_v54, %v2709_v53  ;;  %v1169_v4 = vadd.f32 %v1168_v52, %v1154_v44  ;;  %v3010_v29 = vld [vmem:[#allocation6 + $0x178] sm:$0xf0]  ;;  %v2630_v21 = vor.u32 %v2966_v7, %v2627_v10  ;;  %v3007_v33 = vld [vmem:[#allocation6 + $0x160] sm:$0xf0]  ;;  %v2711_v7 = vld [vmem:[#allocation6 + $0xcc] sm:$0xf0] }
  0xf9   :  { %1834 = vmatpush.bf16.msrb.mxu3 %v2762_v35  ;;  %vm1096_vm10 = vcmp.ge.f32.partialorder %v3501_v18, 0.0  ;;  %v1121_v28 = vsel %vm1089_vm9, %v3489_v57, %v1105_v37  ;;  %v2802_v14 = vor.u32 %v3010_v29, %v2801_v1  ;;  %v2682_v23 = vor.u32 %v2980_v25, %v2681_v15  ;;  %v2963_v31 = vld [vmem:[#allocation6 + $0x4] sm:$0xf]  ;;  %v2615_v37 = vld [vmem:[#allocation6 + $0xc] sm:$0xf0] }
  0xfa   :  { %v1011_v0 = vpop.f32.mrf.mxu2  ;;  %1822 = vmatpush.bf16.msrb.mxu2 %v2642_v22  ;;  %v2738_v32 = vor.u32 %v2993_v24, %v2735_v9  ;;  %v1161_v35 = vmul.f32 %v1137_v38, %v1127_v62  ;;  %v2618_v44 = vor.u32 %v2963_v31, %v2615_v37  ;;  %v1176_v52 = vadd.f32 %v3516_v50, %v1160_v55  ;;  %v2723_v38 = vld [vmem:[#allocation6 + $0xe4] sm:$0xf0]  ;;  %v2974_v50 = vld [vmem:[#allocation6 + $0x58] sm:$0xf0]  ;;  %v2987_v29 = vld [vmem:[#allocation6 + $0xc4] sm:$0xf] }
  0xfb   :  { %v1012_v41 = vadd.f32 %v1011_v0, %v209_v60  ;;  %v1112_v60 = vmul.f32 0.01, %v3501_v18  ;;  %1810 = vmatpush.bf16.msrb.mxu1 %v2710_v58  ;;  %v2658_v62 = vor.u32 %v2974_v50, %v2657_v63  ;;  %v2765_v10 = vld [vmem:[#allocation6 + $0x128] sm:$0xf]  ;;  %v2968_v24 = vld [vmem:[#allocation6 + $0x28] sm:$0xf0] }
  0xfc   :  { %v1025_v19 = vpop.f32.mrf.mxu3  ;;  %1846 = vmatpush.bf16.msra.mxu0 %v2694_v42  ;;  %v3004_v42 = vld [vmem:[#allocation6 + $0x148] sm:$0xf0]  ;;  %v2729_v37 = vld [vmem:[#allocation6 + $0xe0] sm:$0xf] }
  0xfd   :  { %v1026_v56 = vadd.f32 %v1025_v19, %v1012_v41  ;;  %v1128_v51 = vsel %vm1096_vm10, %v3501_v18, %v1112_v60  ;;  %1835 = vmatpush.bf16.msrb.mxu3 %v2750_v6  ;;  %v2669_v41 = vld [vmem:[#allocation6 + $0x68] sm:$0xf]  ;;  %v2990_v60 = vld [vmem:[#allocation6 + $0xdc] sm:$0xf]  ;;  %v2992_v11 = vld [vmem:[#allocation6 + $0xe8] sm:$0xf0] }
  0xfe   :  { %1823 = vmatpush.bf16.msrb.mxu2 %v2630_v21  ;;  %v1162_v22 = vmul.f32 %v1138_v16, %v1128_v51  ;;  %v2726_v61 = vor.u32 %v2990_v60, %v2723_v38  ;;  %v2971_v21 = vld [vmem:[#allocation6 + $0x40] sm:$0xf0]  ;;  %v2753_v51 = vld [vmem:[#allocation6 + $0x110] sm:$0xf] }
  0xff   :  { %vm1097_vm12 = vcmp.ge.f32.partialorder %v1026_v56, 0.0  ;;  %1859 = vmatpush.bf16.msra.mxu1 %v2802_v14  ;;  %v2645_v14 = vld [vmem:[#allocation6 + $0x38] sm:$0xf] }
 0x100   :  { %1847 = vmatpush.bf16.msra.mxu0 %v2682_v23  ;;  %v2646_v15 = vor.u32 %v2971_v21, %v2645_v14  ;;  %v2633_v23 = vld [vmem:[#allocation6 + $0x20] sm:$0xf] }
 0x101   :  { %1836 = vmatpush.bf16.msrb.mxu3 %v2738_v32  ;;  %v2621_v32 = vld [vmem:[#allocation6 + $0x8] sm:$0xf] }
 0x102   :  { %1824 = vmatpush.bf16.msrb.mxu2 %v2618_v44  ;;  %v2717_v44 = vld [vmem:[#allocation6 + $0xc8] sm:$0xf] }
 0x105   :  { %1837 = vmatpush.bf16.msrb.mxu3 %v2726_v61 }
 0x10c   :  { %v1037_v20 = vpop.f32.mrf.mxu0 }
 0x10d   :  { %v1038_v27 = vadd.f32 %v1037_v20, %v210_v5  ;;  %v1155_v20 = vmul.f32 %v1139_v45, %v1121_v28 }
 0x10e   :  { %v1051_v30 = vpop.f32.mrf.mxu1 }
 0x10f   :  { %v1052_v40 = vadd.f32 %v1051_v30, %v1038_v27  ;;  %v1113_v27 = vmul.f32 0.01, %v1026_v56  ;;  %v1170_v48 = vadd.f32 %v1169_v4, %v1155_v20 }
 0x111   :  { %vm1090_vm11 = vcmp.ge.f32.partialorder %v1052_v40, 0.0  ;;  %v1106_v8 = vmul.f32 0.01, %v1052_v40  ;;  %v1129_v47 = vsel %vm1097_vm12, %v1026_v56, %v1113_v27  ;;  %v2741_v27 = vld [vmem:[#allocation6 + $0xf8] sm:$0xf] }
 0x112   :  { %v1065_v3 = vpop.f32.mrf.mxu2  ;;  %v1163_v4 = vmul.f32 %v1139_v45, %v1129_v47 }
 0x113   :  { %v1066_v57 = vadd.f32 %v1065_v3, %v211_v2  ;;  %v1122_v13 = vsel %vm1090_vm11, %v1052_v40, %v1106_v8  ;;  %v2977_v40 = vld [vmem:[#allocation6 + $0x70] sm:$0xf0]  ;;  %v2777_v8 = vld [vmem:[#allocation6 + $0x140] sm:$0xf]  ;;  %v1177_v3 = vadd.f32 %v1176_v52, %v1161_v35 }
 0x114   :  { %v1039_v12 = vpop.f32.mrf.mxu0  ;;  %v1079_v0 = vpop.f32.mrf.mxu3  ;;  %v1156_v18 = vmul.f32 %v1140_v39, %v1122_v13  ;;  %v2670_v49 = vor.u32 %v2977_v40, %v2669_v41  ;;  %v2778_v1 = vor.u32 %v3004_v42, %v2777_v8  ;;  %v2989_v40 = vld [vmem:[#allocation6 + $0xd0] sm:$0xf0] }
 0x115   :  { %v1040_v17 = vadd.f32 %v1039_v12, %v210_v5  ;;  %v1080_v30 = vadd.f32 %v1079_v0, %v1066_v57  ;;  %v2790_v5 = vor.u32 %v3007_v33, %v2789_v26  ;;  %v2714_v12 = vor.u32 %v2987_v29, %v2711_v7  ;;  %v3001_v0 = vld [vmem:[#allocation6 + $0x130] sm:$0xf0] }
 0x116   :  { %v1053_v19 = vpop.f32.mrf.mxu1  ;;  %v1171_v58 = vadd.f32 %v1170_v48, %v1156_v18  ;;  %1848 = vmatpush.bf16.msra.mxu0 %v2670_v49  ;;  %v2766_v13 = vor.u32 %v3001_v0, %v2765_v10  ;;  %v2634_v26 = vor.u32 %v2968_v24, %v2633_v23  ;;  %v2965_v33 = vld [vmem:[#allocation6 + $0x10] sm:$0xf0]  ;;  %v1225_v18 = vld [vmem:[%s3582_s6] sm:$0x3]  ;;  %v2718_v48 = vor.u32 %v2989_v40, %v2717_v44 }
 0x117   :  { %v1054_v36 = vadd.f32 %v1053_v19, %v1040_v17  ;;  %vm1091_vm13 = vcmp.ge.f32.partialorder %v1080_v30, 0.0  ;;  %v1107_v43 = vmul.f32 0.01, %v1080_v30  ;;  %1860 = vmatpush.bf16.msra.mxu1 %v2790_v5  ;;  %1838 = vmatpush.bf16.msrb.mxu3 %v2714_v12  ;;  %v2998_v17 = vld [vmem:[#allocation6 + $0x118] sm:$0xf0]  ;;  %v2622_v31 = vor.u32 %v2965_v33, %v2621_v32 }
 0x118   :  { %v2754_v20 = vor.u32 %v2998_v17, %v2753_v51  ;;  %v1228_v49 = vperm.slane %v1225_v18, 1  ;;  %v1185_v7 = vstv %s3580_s4 }
 0x119   :  { %vm1098_vm14 = vcmp.ge.f32.partialorder %v1054_v36, 0.0  ;;  %v1114_v46 = vmul.f32 0.01, %v1054_v36  ;;  %v1123_v53 = vsel %vm1091_vm13, %v1080_v30, %v1107_v43  ;;  %v2995_v30 = vld [vmem:[#allocation6 + $0x100] sm:$0xf0]  ;;  %v2730_v43 = vor.u32 %v2992_v11, %v2729_v37 }
 0x11a   :  { %v1067_v54 = vpop.f32.mrf.mxu2  ;;  %v1157_v28 = vmul.f32 %v1141_v34, %v1123_v53  ;;  %1849 = vmatpush.bf16.msra.mxu0 %v2658_v62  ;;  %v2742_v5 = vor.u32 %v2995_v30, %v2741_v27 }
 0x11b   :  { %v1130_v55 = vsel %vm1098_vm14, %v1054_v36, %v1114_v46  ;;  %v1068_v16 = vadd.f32 %v1067_v54, %v211_v2  ;;  %1861 = vmatpush.bf16.msra.mxu1 %v2778_v1  ;;  %v1178_v2 = vadd.f32 %v1177_v3, %v1162_v22 }
 0x11c   :  { %v1081_v56 = vpop.f32.mrf.mxu3  ;;  %v1172_v6 = vadd.f32 %v1171_v58, %v1157_v28  ;;  %v1164_v59 = vmul.f32 %v1140_v39, %v1130_v55 }
 0x11d   :  { %v1082_v57 = vadd.f32 %v1081_v56, %v1068_v16  ;;  %v1179_v25 = vadd.f32 %v1178_v2, %v1163_v4 }
 0x11e   :  { %1173 = vadd.xlane.f32.xlu2 %v1172_v6  ;;  %1850 = vmatpush.bf16.msra.mxu0 %v2646_v15 }
 0x11f   :  { %vm1099_vm15 = vcmp.ge.f32.partialorder %v1082_v57, 0.0  ;;  %v1115_v45 = vmul.f32 0.01, %v1082_v57  ;;  %1862 = vmatpush.bf16.msra.mxu1 %v2766_v13  ;;  %v1180_v9 = vadd.f32 %v1179_v25, %v1164_v59 }
 0x121   :  { %v1131_v19 = vsel %vm1099_vm15, %v1082_v57, %v1115_v45  ;;  %v1525_v45 = vld [vmem:[%s3584_s8] sm:$0x7]  ;;  %s3124_s8 = smov [#allocation8]  }
 0x122   :  { %v1165_v39 = vmul.f32 %v1141_v34, %v1131_v19  ;;  %1851 = vmatpush.bf16.msra.mxu0 %v2634_v26  ;;  %v1227_v34 = vperm.slane %v1225_v18, 0  ;;  %v1527_v51 = vperm.slane %v1525_v45, 0  ;;  %v1529_v17 = vperm.slane %v1525_v45, 2 }
 0x123   :  { %1863 = vmatpush.bf16.msra.mxu1 %v2754_v20  ;;  %v1528_v20 = vperm.slane %v1525_v45, 1 }
 0x124   :  { %v1181_v36 = vadd.f32 %v1180_v9, %v1165_v39 }
 0x126   :  { %1182 = vadd.xlane.f32.xlu2 %v1181_v36  ;;  %1852 = vmatpush.bf16.msra.mxu0 %v2622_v31 }
 0x127   :  { %1864 = vmatpush.bf16.msra.mxu1 %v2742_v5 }
 0x12b   :  { %1865 = vmatpush.bf16.msra.mxu1 %v2730_v43 }
 0x12c   :  { %v1400_v41 = vpop.f32.mrf.mxu0 }
 0x12d   :  { %v1401_v46 = vadd.f32 %v1400_v41, %v1227_v34 }
 0x12e   :  { %v1414_v35 = vpop.f32.mrf.mxu1 }
 0x12f   :  { %v1415_v60 = vadd.f32 %v1414_v35, %v1401_v46  ;;  %1866 = vmatpush.bf16.msra.mxu1 %v2718_v48 }
 0x131   :  { %v1451_v42 = vmul.f32 0.01, %v1415_v60  ;;  %vm1447_vm0 = vcmp.ge.f32.partialorder %v1415_v60, 0.0 }
 0x132   :  { %v1428_v52 = vpop.f32.mrf.mxu2 }
 0x133   :  { %v1429_v38 = vadd.f32 %v1428_v52, %v1228_v49  ;;  %v1455_v61 = vsel %vm1447_vm0, %v1415_v60, %v1451_v42 }
 0x134   :  { %v1442_v22 = vpop.f32.mrf.mxu3  ;;  %v1402_v47 = vpop.f32.mrf.mxu0 }
 0x135   :  { %v1403_v53 = vadd.f32 %v1402_v47, %v1227_v34  ;;  %v1443_v58 = vadd.f32 %v1442_v22, %v1429_v38 }
 0x136   :  { %v1416_v8 = vpop.f32.mrf.mxu1 }
 0x137   :  { %v1417_v54 = vadd.f32 %v1416_v8, %v1403_v53  ;;  %v1452_v1 = vmul.f32 0.01, %v1443_v58  ;;  %vm1448_vm2 = vcmp.ge.f32.partialorder %v1443_v58, 0.0 }
 0x139   :  { %vm1449_vm1 = vcmp.ge.f32.partialorder %v1417_v54, 0.0  ;;  %v1453_v28 = vmul.f32 0.01, %v1417_v54  ;;  %v1456_v4 = vsel %vm1448_vm2, %v1443_v58, %v1452_v1 }
 0x13a   :  { %v1430_v50 = vpop.f32.mrf.mxu2 }
 0x13b   :  { %v1457_v63 = vsel %vm1449_vm1, %v1417_v54, %v1453_v28  ;;  %v1431_v16 = vadd.f32 %v1430_v50, %v1228_v49 }
 0x13c   :  { %v1459_v55 = vpack.c.bf16 %v1457_v63, %v1455_v61  ;;  %v1444_v56 = vpop.f32.mrf.mxu3 }
 0x13d   :  { %v1445_v62 = vadd.f32 %v1444_v56, %v1431_v16 }
 0x13e   :  { %1797 = vmatmul.bf16.vlgmr.msrb.gmra.mxu0 %v1459_v55  ;;  %1825 = vmatmul.bf16.vlgmr.msrb.gmra.mxu2 %v1459_v55 }
 0x13f   :  { %vm1450_vm3 = vcmp.ge.f32.partialorder %v1445_v62, 0.0  ;;  %v1454_v3 = vmul.f32 0.01, %v1445_v62 }
 0x141   :  { %v1458_v6 = vsel %vm1450_vm3, %v1445_v62, %v1454_v3 }
 0x142   :  { %v1460_v29 = vpack.c.bf16 %v1458_v6, %v1456_v4 }
 0x144   :  { %1811 = vmatmul.bf16.vlgmr.msrb.gmra.mxu1 %v1460_v29  ;;  %1839 = vmatmul.bf16.vlgmr.msrb.gmra.mxu3 %v1460_v29 }
 0x14e   :  { %1853 = vmatmul.bf16.vlgmr.msra.gmra.mxu0 %v1459_v55 }
 0x154   :  { %1867 = vmatmul.bf16.vlgmr.msra.gmra.mxu1 %v1460_v29 }
 0x191   :  { %v1174_v10 = vpop.xlane.xlu2 %1173 }
 0x192   :  { %v1186_v57 = vadd.f32 %v1185_v7, %v1174_v10 }
 0x194   :  { %3020 = vtanh.f32 %v1186_v57 }
 0x199   :  { %v1183_v12 = vpop.xlane.xlu2 %1182 }
 0x19a   :  { %v3021_v0 = vpop.eup %3020  ;;  %v1187_v59 = vadd.f32 %v1185_v7, %v1183_v12 }
 0x19b   :  { %1191 = vst.msk [vmem:[%s3586_s10] sm:$0xff] %vm1190_vm4, %v3021_v0 }
 0x19c   :  { %3022 = vtanh.f32 %v1187_v59 }
 0x1a2   :  { %v3023_v2 = vpop.eup %3022 }
 0x1a3   :  { %1192 = vst.msk [vmem:[%s3586_s10 + $0x8] sm:$0xff] %vm1190_vm4, %v3023_v2  ;;  %s1951_s10 = sshll.u32 %s3124_s8, 4  ;;  %s1952_s10 = int_to_ptr.vmem [resolvable:$true] %s1951_s10 }
 0x1bb   :  { %v1798_v13 = vpop.f32.mrf.mxu0 }
 0x1bc   :  { %v1799_v24 = vadd.f32 %v1798_v13, %v1527_v51 }
 0x1c1   :  { %v1812_v14 = vpop.f32.mrf.mxu1  ;;  %v1826_v19 = vpop.f32.mrf.mxu2 }
 0x1c2   :  { %v1813_v26 = vadd.f32 %v1812_v14, %v1799_v24  ;;  %v1827_v27 = vadd.f32 %v1826_v19, %v1528_v20 }
 0x1c3   :  { %v1800_v21 = vpop.f32.mrf.mxu0 }
 0x1c4   :  { %v1801_v31 = vadd.f32 %v1800_v21, %v1527_v51 }
 0x1c7   :  { %v1840_v23 = vpop.f32.mrf.mxu3 }
 0x1c8   :  { %v1841_v32 = vadd.f32 %v1840_v23, %v1827_v27 }
 0x1c9   :  { %v1814_v15 = vpop.f32.mrf.mxu1  ;;  %v1828_v5 = vpop.f32.mrf.mxu2 }
 0x1ca   :  { %v1815_v41 = vadd.f32 %v1814_v15, %v1801_v31  ;;  %v1829_v35 = vadd.f32 %v1828_v5, %v1528_v20 }
 0x1cb   :  { %v1854_v25 = vpop.f32.mrf.mxu0 }
 0x1cc   :  { %v1855_v39 = vadd.f32 %v1854_v25, %v1529_v17 }
 0x1cf   :  { %v1842_v11 = vpop.f32.mrf.mxu3 }
 0x1d0   :  { %v1843_v44 = vadd.f32 %v1842_v11, %v1829_v35 }
 0x1d1   :  { %v1868_v9 = vpop.f32.mrf.mxu1 }
 0x1d2   :  { %v1869_v30 = vadd.f32 %v1868_v9, %v1855_v39 }
 0x1d3   :  { %v1856_v36 = vpop.f32.mrf.mxu0 }
 0x1d4   :  { %v1873_v33 = vmax.f32 %v1813_v26, %v1869_v30  ;;  %v1857_v37 = vadd.f32 %v1856_v36, %v1529_v17 }
 0x1d6   :  { %v1874_v18 = vmax.f32 %v1873_v33, %v1841_v32 }
 0x1d8   :  { %1875 = vmax.xlane.f32.xlu0 %v1874_v18 }
 0x1d9   :  { %v1870_v34 = vpop.f32.mrf.mxu1 }
 0x1da   :  { %v1871_v43 = vadd.f32 %v1870_v34, %v1857_v37 }
 0x1dc   :  { %v1877_v40 = vmax.f32 %v1815_v41, %v1871_v43 }
 0x1de   :  { %v1878_v46 = vmax.f32 %v1877_v40, %v1843_v44 }
 0x1e0   :  { %1879 = vmax.xlane.f32.xlu0 %v1878_v46 }
 0x24b   :  { %v1876_v48 = vpop.xlane.xlu0 %1875 }
 0x24c   :  { %v1881_v49 = vsub.f32 %v1813_v26, %v1876_v48  ;;  %v1882_v60 = vsub.f32 %v1841_v32, %v1876_v48  ;;  %v1883_v52 = vsub.f32 %v1869_v30, %v1876_v48 }
 0x24e   :  { %v1887_v22 = vmul.f32 1.442695, %v1881_v49  ;;  %v1889_v47 = vmul.f32 1.442695, %v1882_v60  ;;  %v1891_v53 = vmul.f32 1.442695, %v1883_v52 }
 0x250   :  { %3024 = vpow2.f32 %v1887_v22 }
 0x251   :  { %3026 = vpow2.f32 %v1889_v47 }
 0x252   :  { %3028 = vpow2.f32 %v1891_v53 }
 0x253   :  { %v1880_v38 = vpop.xlane.xlu0 %1879 }
 0x254   :  { %v1884_v8 = vsub.f32 %v1815_v41, %v1880_v38  ;;  %v1885_v42 = vsub.f32 %v1843_v44, %v1880_v38  ;;  %v1886_v54 = vsub.f32 %v1871_v43, %v1880_v38 }
 0x256   :  { %v3025_v28 = vpop.eup %3024  ;;  %v1893_v58 = vmul.f32 1.442695, %v1884_v8  ;;  %v1895_v61 = vmul.f32 1.442695, %v1885_v42  ;;  %v1897_v50 = vmul.f32 1.442695, %v1886_v54 }
 0x257   :  { %v3027_v63 = vpop.eup %3026 }
 0x258   :  { %3030 = vpow2.f32 %v1893_v58  ;;  %v1899_v55 = vadd.f32 %v3027_v63, %v3025_v28  ;;  %v3029_v16 = vpop.eup %3028 }
 0x259   :  { %3032 = vpow2.f32 %v1895_v61 }
 0x25a   :  { %v1900_v56 = vadd.f32 %v3029_v16, %v1899_v55  ;;  %3034 = vpow2.f32 %v1897_v50 }
 0x25c   :  { %1901 = vadd.xlane.f32.xlu1 %v1900_v56 }
 0x25e   :  { %v3031_v1 = vpop.eup %3030 }
 0x25f   :  { %v3033_v62 = vpop.eup %3032 }
 0x260   :  { %v1903_v3 = vadd.f32 %v3033_v62, %v3031_v1  ;;  %v3035_v4 = vpop.eup %3034 }
 0x262   :  { %v1904_v6 = vadd.f32 %v3035_v4, %v1903_v3 }
 0x264   :  { %1905 = vadd.xlane.f32.xlu1 %v1904_v6 }
 0x2cf   :  { %v1902_v29 = vpop.xlane.xlu1 %1901 }
 0x2d0   :  { %3036 = vrcp.f32 %v1902_v29  ;;  %v1918_v0 = vand.u32 2147483648, %v1902_v29  ;;  %v1916_v2 = vand.u32 2147483647, %v1902_v29  ;;  %vm1912_vm6 = vweird.f32 %v1902_v29 }
 0x2d2   :  { %v1919_v21 = vor.u32 1.1754944e-38, %v1918_v0  ;;  %vm1917_vm8 = vcmp.eq.f32.partialorder %v1916_v2, 8.507059e+37 }
 0x2d6   :  { %v3037_v7 = vpop.eup %3036 }
 0x2d7   :  { %v1908_v10 = vmul.f32 %v3037_v7, %v1902_v29  ;;  %v1906_v57 = vpop.xlane.xlu1 %1905  ;;  %vm1913_vm5 = vweird.f32 %v3037_v7 }
 0x2d8   :  { %3038 = vrcp.f32 %v1906_v57  ;;  %vm1914_vm7 = vmor %vm1912_vm6, %vm1913_vm5  ;;  %v1932_v23 = vand.u32 2147483648, %v1906_v57  ;;  %v1930_v39 = vand.u32 2147483647, %v1906_v57  ;;  %vm1926_vm10 = vweird.f32 %v1906_v57 }
 0x2d9   :  { %v1909_v12 = vsub.f32 1.0, %v1908_v10 }
 0x2da   :  { %v1933_v26 = vor.u32 1.1754944e-38, %v1932_v23  ;;  %vm1931_vm12 = vcmp.eq.f32.partialorder %v1930_v39, 8.507059e+37 }
 0x2db   :  { %v1910_v59 = vmul.f32 %v3037_v7, %v1909_v12 }
 0x2dd   :  { %v1911_v13 = vadd.f32 %v3037_v7, %v1910_v59 }
 0x2de   :  { %v3039_v14 = vpop.eup %3038 }
 0x2df   :  { %v1915_v45 = vsel %vm1914_vm7, %v3037_v7, %v1911_v13  ;;  %v1922_v15 = vmul.f32 %v3039_v14, %v1906_v57  ;;  %vm1927_vm9 = vweird.f32 %v3039_v14 }
 0x2e0   :  { %v1920_v25 = vsel %vm1917_vm8, %v1919_v21, %v1915_v45  ;;  %vm1928_vm11 = vmor %vm1926_vm10, %vm1927_vm9 }
 0x2e1   :  { %v1935_v51 = vmul.f32 %v3025_v28, %v1920_v25  ;;  %v1936_v17 = vmul.f32 %v3027_v63, %v1920_v25  ;;  %v1937_v19 = vmul.f32 %v3029_v16, %v1920_v25  ;;  %v1923_v20 = vsub.f32 1.0, %v1922_v15 }
 0x2e3   :  { %1941 = vst [vmem:[#allocation8] sm:$0xff] %v1935_v51  ;;  %v1924_v24 = vmul.f32 %v3039_v14, %v1923_v20 }
 0x2e4   :  { %1942 = vst [vmem:[#allocation8 + $0x8] sm:$0xff] %v1936_v17 }
 0x2e5   :  { %1943 = vst [vmem:[#allocation8 + $0x10] sm:$0xff] %v1937_v19  ;;  %v1925_v9 = vadd.f32 %v3039_v14, %v1924_v24 }
 0x2e7   :  { %v1929_v27 = vsel %vm1928_vm11, %v3039_v14, %v1925_v9 }
 0x2e8   :  { %v1934_v30 = vsel %vm1931_vm12, %v1933_v26, %v1929_v27 }
 0x2e9   :  { %v1938_v32 = vmul.f32 %v3031_v1, %v1934_v30  ;;  %v1939_v33 = vmul.f32 %v3033_v62, %v1934_v30  ;;  %v1940_v36 = vmul.f32 %v3035_v4, %v1934_v30 }
 0x2eb   :  { %1944 = vst [vmem:[#allocation8 + $0x18] sm:$0xff] %v1938_v32 }
 0x2ec   :  { %1945 = vst [vmem:[#allocation8 + $0x20] sm:$0xff] %v1939_v33 }
 0x2ed   :  { %1946 = vst [vmem:[#allocation8 + $0x28] sm:$0xff] %v1940_v36 }
 0x2ee   :  { %1959 = dma.vmem_to_hbm [thread:$0]  %s1952_s10, 768, %s1954_s13, [#allocation5], %s3125_s14, %s3125_s14, %s3126_s15  }
 0x2ef   :  { %3116 = dma.done.wait [#allocation5], 768  }
 0x2f0   :  { %3117 = vsyncadd [#allocation5], 4294966528 }
 0x2f1   :  { %1968 = vsyncpa [#allocation4], 1 }
 0x2f2   :  { %1969 = vsyncpa [#allocation7], 1 }
 0x2f3   :  { %1970 = vsyncpa [#allocation5], 1 }

</bundles_post_ra>
